<compile_context>
chip_gen: v6e
topology: v6e:2x2x1
jax: 0.10.0
libtpu: 0.0.40
codegen_flags: <defaults>
</compile_context>

<pallas_src>
import numpy as np
import jax
import jax.numpy as jnp
from jax import lax
from jax.experimental import pallas as pl
from jax.experimental.pallas import tpu as pltpu


def _make_kernel(block_n, n_total, mask_tail):
    def kernel(x_ref, w1_ref, b1_ref, w2t_ref, b2_ref, bs_ref, bc_ref, o_ref):
        x = x_ref[...].astype(jnp.float32)                       # (Nb, C, HW)

        if mask_tail:
            # Tail block: zero the padded batch rows. All reductions are
            # per-row, so this only keeps the padded rows finite; their
            # outputs are discarded by the masked writeback anyway.
            row = lax.broadcasted_iota(jnp.int32, (block_n, 1, 1), 0)
            valid = (row + pl.program_id(0) * block_n) < n_total
            x = jnp.where(valid, x, 0.0)

        # ---- channel attention: avg-pool -> 1x1 conv -> ReLU -> 1x1 conv -> sigmoid.
        # CR = C//reduction is tiny, so run the MLP on the VPU/XLU
        # (broadcast-mul + reduce) instead of two nearly-empty MXU matmuls.
        pooled = jnp.mean(x, axis=2)                              # (Nb, C)
        w1 = w1_ref[...]                                          # (CR, C)
        h = jnp.sum(pooled[:, None, :] * w1[None, :, :], axis=2)  # (Nb, CR)
        h = jnp.maximum(h + b1_ref[...], 0.0)
        w2t = w2t_ref[...]                                        # (CR, C)
        s = jnp.sum(h[:, :, None] * w2t[None, :, :], axis=1)      # (Nb, C)
        s = jax.nn.sigmoid(s + b2_ref[...])

        chn = x * s[:, :, None]                                   # (Nb, C, HW)

        # ---- spatial attention: channel mean/max -> 7x7 conv (pad=3) -> sigmoid,
        # folded into ONE MXU matmul against the stacked banded matrix.
        avg = jnp.mean(chn, axis=1)                               # (Nb, HW)
        mx = jnp.max(chn, axis=1)                                 # (Nb, HW)
        lhs = jnp.concatenate([avg, mx], axis=1)                  # (Nb, 2*HW)
        conv = jnp.dot(lhs.astype(bs_ref.dtype), bs_ref[...],
                       preferred_element_type=jnp.float32) + bc_ref[0]
        sa = jax.nn.sigmoid(conv)                                 # (Nb, HW)

        o_ref[...] = (sa[:, None, :] * chn).astype(o_ref.dtype)   # lane-dense stores
    return kernel


def _banded_conv_matrices(wc, H, W):
    """Fold the 7x7 / pad=3 cross-correlation into two (HW, HW) matrices.

    out_flat[p] = sum_q map_flat[q] * B[q, p], with p = y*W + x, q = r*W + s,
    B[q, p] = w[r - y + 3, s - x + 3] when both offsets lie in [0, 7)
    (the conv's zero-padding is encoded by the zero entries of B).
    """
    wsp = wc.reshape(2, 7, 7).astype(jnp.float32)
    r = jnp.arange(H)[:, None, None, None]
    s = jnp.arange(W)[None, :, None, None]
    y = jnp.arange(H)[None, None, :, None]
    x = jnp.arange(W)[None, None, None, :]
    di = r - y + 3
    dj = s - x + 3
    valid = (di >= 0) & (di < 7) & (dj >= 0) & (dj < 7)
    dic = jnp.clip(di, 0, 6)
    djc = jnp.clip(dj, 0, 6)
    b_avg = jnp.where(valid, wsp[0][dic, djc], 0.0).reshape(H * W, H * W)
    b_max = jnp.where(valid, wsp[1][dic, djc], 0.0).reshape(H * W, H * W)
    return b_avg, b_max


def _is_multi_tensorcore():
    """True on parts exposing >1 TensorCore behind one JAX device (v7x, v4 megacore)."""
    try:
        kind = jax.devices()[0].device_kind.lower()
    except Exception:
        return False
    return any(tag in kind for tag in ("v7", "7x", "v4"))


def cbam_forward(x, w1, b1, w2, b2, wc, bc, *, block_n=None,
                 bulk_dtype=jnp.float32):
    N, C, H, W = x.shape
    HW = H * W
    CR = w1.shape[0]
    itemsize = np.dtype(bulk_dtype).itemsize

    xf = x.reshape(N, C, HW).astype(bulk_dtype)          # lane-dense trailing dim

    b_avg, b_max = _banded_conv_matrices(wc, H, W)
    b_stack = jnp.concatenate([b_avg, b_max], axis=0).astype(bulk_dtype)  # (2*HW, HW)
    w1m = jnp.asarray(w1, jnp.float32).reshape(CR, C)    # (CR, C)
    w2t = jnp.asarray(w2, jnp.float32).T.reshape(CR, C)  # (CR, C)
    b1r = jnp.asarray(b1, jnp.float32).reshape(1, CR)
    b2r = jnp.asarray(b2, jnp.float32).reshape(1, C)
    bcr = jnp.asarray(bc, jnp.float32).reshape(1)

    # --- tiling heuristic (perf review):
    #  * no divisibility requirement -> grid = cdiv(N, block_n), masked tail
    #  * block_n near 128 rows (MXU-friendly M), capped at ~2 MiB input block
    #    so double-buffered in+out fits the v5e 16 MiB default scoped VMEM
    #  * ">=2 grid steps" enforced only on multi-TensorCore parts
    if block_n is None:
        cap_rows = max(1, (2 << 20) // (C * HW * itemsize))
        block_n = max(1, min(N, 128, cap_rows))
        if _is_multi_tensorcore() and N >= 2:
            block_n = min(block_n, pl.cdiv(N, 2))
    grid_n = pl.cdiv(N, block_n)
    mask_tail = (N % block_n) != 0

    kernel = _make_kernel(block_n, N, mask_tail)

    weight_bytes = sum(int(a.size) * a.dtype.itemsize
                       for a in (b_stack, w1m, w2t, b1r, b2r))
    vmem_need = 4 * block_n * C * HW * itemsize + 2 * weight_bytes + (2 << 20)
    vmem_limit = int(min(64 << 20, max(vmem_need, 16 << 20)))

    def call(single_buffer_consts):
        def const_spec(shape):
            idx = lambda n: (0,) * len(shape)
            if single_buffer_consts:
                # Constants are fetched once with a constant index map;
                # single-buffer them so they don't double their VMEM footprint.
                return pl.BlockSpec(shape, idx, pipeline_mode=pl.Buffered(1))
            return pl.BlockSpec(shape, idx)

        return pl.pallas_call(
            kernel,
            out_shape=jax.ShapeDtypeStruct((N, C, HW), bulk_dtype),
            grid=(grid_n,),
            in_specs=[
                pl.BlockSpec((block_n, C, HW), lambda n: (n, 0, 0)),
                const_spec((CR, C)),          # w1
                const_spec((1, CR)),          # b1
                const_spec((CR, C)),          # w2^T
                const_spec((1, C)),           # b2
                const_spec((2 * HW, HW)),     # stacked banded conv matrix
                pl.BlockSpec(memory_space=pltpu.MemorySpace.SMEM),  # conv bias
            ],
            out_specs=pl.BlockSpec((block_n, C, HW), lambda n: (n, 0, 0)),
            compiler_params=pltpu.CompilerParams(
                dimension_semantics=("parallel",),
                vmem_limit_bytes=vmem_limit,
            ),
        )(xf, w1m, b1r, w2t, b2r, b_stack, bcr)

    try:
        out = call(single_buffer_consts=True)
    except Exception:
        # Fallback for JAX builds without BlockSpec pipeline_mode / Buffered(1).
        out = call(single_buffer_consts=False)

    return out.reshape(N, C, H, W).astype(x.dtype)


def cbam_reference(x, w1, b1, w2, b2, wc, bc):
    """Pure-JAX reference mirroring the PyTorch forward."""
    pooled = jnp.mean(x, axis=(2, 3), keepdims=True)                         # (N,C,1,1)
    h = jax.nn.relu(jnp.einsum('nchw,oc->nohw', pooled, w1) + b1[None, :, None, None])
    s = jax.nn.sigmoid(jnp.einsum('nchw,oc->nohw', h, w2) + b2[None, :, None, None])
    chn = s * x
    avg = jnp.mean(chn, axis=1, keepdims=True)
    mx = jnp.max(chn, axis=1, keepdims=True)
    cat = jnp.concatenate([avg, mx], axis=1)                                 # (N,2,H,W)
    sa = lax.conv_general_dilated(cat, wc, window_strides=(1, 1),
                                  padding=((3, 3), (3, 3)),
                                  dimension_numbers=('NCHW', 'OIHW', 'NCHW'))
    sa = jax.nn.sigmoid(sa + bc[None, :, None, None])
    return sa * chn


if __name__ == "__main__":
    N, C, H, W = 2, 32, 16, 16
    REDUCTION = 16
    CR = C // REDUCTION                      # 2

    key = jax.random.PRNGKey(0)
    k = jax.random.split(key, 7)
    x = jax.random.normal(k[0], (N, C, H, W), jnp.float32)

    # Deterministic synthetic parameters (shapes from the PyTorch __init__):
    w1 = jax.random.normal(k[1], (CR, C), jnp.float32) * 0.2    # Conv2d(C, C//r, 1) weight (squeezed)
    b1 = jax.random.normal(k[2], (CR,), jnp.float32) * 0.1
    w2 = jax.random.normal(k[3], (C, CR), jnp.float32) * 0.2    # Conv2d(C//r, C, 1) weight (squeezed)
    b2 = jax.random.normal(k[4], (C,), jnp.float32) * 0.1
    wc = jax.random.normal(k[5], (1, 2, 7, 7), jnp.float32) * 0.1  # Conv2d(2, 1, 7, padding=3)
    bc = jax.random.normal(k[6], (1,), jnp.float32) * 0.1

    out = cbam_forward(x, w1, b1, w2, b2, wc, bc)
    out = jax.block_until_ready(out)

    ref = cbam_reference(x, w1, b1, w2, b2, wc, bc)
    assert out.shape == (N, C, H, W)
    err = float(jnp.max(jnp.abs(out - ref)))
    assert jnp.allclose(out, ref, rtol=1e-4, atol=1e-4), err

    print("KERNEL_OK")
</pallas_src>

<mosaic_0001>
module attributes {stable_mosaic.version = 11 : i64} {
  func.func @kernel(%arg0: i32, %arg1: memref<2x32x256xf32, #tpu.memory_space<vmem>>, %arg2: memref<2x32xf32, #tpu.memory_space<vmem>>, %arg3: memref<1x2xf32, #tpu.memory_space<vmem>>, %arg4: memref<2x32xf32, #tpu.memory_space<vmem>>, %arg5: memref<1x32xf32, #tpu.memory_space<vmem>>, %arg6: memref<512x256xf32, #tpu.memory_space<vmem>>, %arg7: memref<1xf32, #tpu.memory_space<smem>>, %arg8: memref<2x32x256xf32, #tpu.memory_space<vmem>>) attributes {dimension_semantics = [#tpu.dimension_semantics<parallel>], iteration_bounds = array<i64: 1>, scalar_prefetch = 0 : i64, scratch_operands = 0 : i64, tpu.core_type = #tpu.core_type<tc>, window_params = [{transform_indices = @transform_0, window_bounds = array<i64: 2, 32, 256>}, {pipeline_mode = #tpu.pipeline_mode<synchronous>, transform_indices = @transform_1, window_bounds = array<i64: 2, 32>}, {pipeline_mode = #tpu.pipeline_mode<synchronous>, transform_indices = @transform_2, window_bounds = array<i64: 1, 2>}, {pipeline_mode = #tpu.pipeline_mode<synchronous>, transform_indices = @transform_3, window_bounds = array<i64: 2, 32>}, {pipeline_mode = #tpu.pipeline_mode<synchronous>, transform_indices = @transform_4, window_bounds = array<i64: 1, 32>}, {pipeline_mode = #tpu.pipeline_mode<synchronous>, transform_indices = @transform_5, window_bounds = array<i64: 512, 256>}, {transform_indices = @transform_6, window_bounds = array<i64: 1>}, {transform_indices = @transform_7, window_bounds = array<i64: 2, 32, 256>}]} {
    %c0 = arith.constant 0 : index
    %c0_0 = arith.constant 0 : index
    %c0_1 = arith.constant 0 : index
    %0 = vector.load %arg1[%c0, %c0_0, %c0_1] : memref<2x32x256xf32, #tpu.memory_space<vmem>>, vector<2x32x256xf32>
    %cst = arith.constant dense<0.000000e+00> : vector<2x32xf32>
    %1 = vector.multi_reduction <add>, %0, %cst [2] : vector<2x32x256xf32> to vector<2x32xf32>
    %cst_2 = arith.constant 2.560000e+02 : f32
    %2 = vector.broadcast %cst_2 : f32 to vector<2x32xf32>
    %3 = arith.divf %1, %2 : vector<2x32xf32>
    %c0_3 = arith.constant 0 : index
    %c0_4 = arith.constant 0 : index
    %4 = vector.load %arg2[%c0_3, %c0_4] : memref<2x32xf32, #tpu.memory_space<vmem>>, vector<2x32xf32>
    %5 = vector.shape_cast %3 : vector<2x32xf32> to vector<2x1x32xf32>
    %6 = vector.shape_cast %4 : vector<2x32xf32> to vector<1x2x32xf32>
    %7 = vector.broadcast %5 : vector<2x1x32xf32> to vector<2x2x32xf32>
    %8 = vector.broadcast %6 : vector<1x2x32xf32> to vector<2x2x32xf32>
    %9 = arith.mulf %7, %8 : vector<2x2x32xf32>
    %cst_5 = arith.constant dense<0.000000e+00> : vector<2x2xf32>
    %10 = vector.multi_reduction <add>, %9, %cst_5 [2] : vector<2x2x32xf32> to vector<2x2xf32>
    %c0_6 = arith.constant 0 : index
    %c0_7 = arith.constant 0 : index
    %11 = vector.load %arg3[%c0_6, %c0_7] : memref<1x2xf32, #tpu.memory_space<vmem>>, vector<1x2xf32>
    %12 = vector.broadcast %11 : vector<1x2xf32> to vector<2x2xf32>
    %13 = arith.addf %10, %12 : vector<2x2xf32>
    %cst_8 = arith.constant 0.000000e+00 : f32
    %14 = vector.broadcast %cst_8 : f32 to vector<2x2xf32>
    %15 = arith.maximumf %13, %14 : vector<2x2xf32>
    %c0_9 = arith.constant 0 : index
    %c0_10 = arith.constant 0 : index
    %16 = vector.load %arg4[%c0_9, %c0_10] : memref<2x32xf32, #tpu.memory_space<vmem>>, vector<2x32xf32>
    %17 = vector.shape_cast %15 : vector<2x2xf32> to vector<2x2x1xf32>
    %18 = vector.shape_cast %16 : vector<2x32xf32> to vector<1x2x32xf32>
    %19 = vector.broadcast %17 : vector<2x2x1xf32> to vector<2x2x32xf32>
    %20 = vector.broadcast %18 : vector<1x2x32xf32> to vector<2x2x32xf32>
    %21 = arith.mulf %19, %20 : vector<2x2x32xf32>
    %cst_11 = arith.constant dense<0.000000e+00> : vector<2x32xf32>
    %22 = vector.multi_reduction <add>, %21, %cst_11 [1] : vector<2x2x32xf32> to vector<2x32xf32>
    %c0_12 = arith.constant 0 : index
    %c0_13 = arith.constant 0 : index
    %23 = vector.load %arg5[%c0_12, %c0_13] : memref<1x32xf32, #tpu.memory_space<vmem>>, vector<1x32xf32>
    %24 = vector.broadcast %23 : vector<1x32xf32> to vector<2x32xf32>
    %25 = arith.addf %22, %24 : vector<2x32xf32>
    %26 = arith.negf %25 : vector<2x32xf32>
    %27 = math.exp %26 : vector<2x32xf32>
    %cst_14 = arith.constant 1.000000e+00 : f32
    %28 = vector.broadcast %cst_14 : f32 to vector<2x32xf32>
    %29 = arith.addf %28, %27 : vector<2x32xf32>
    %30 = arith.divf %28, %29 : vector<2x32xf32>
    %31 = vector.shape_cast %30 : vector<2x32xf32> to vector<2x32x1xf32>
    %32 = vector.broadcast %31 : vector<2x32x1xf32> to vector<2x32x256xf32>
    %33 = arith.mulf %0, %32 : vector<2x32x256xf32>
    %cst_15 = arith.constant dense<0.000000e+00> : vector<2x256xf32>
    %34 = vector.multi_reduction <add>, %33, %cst_15 [1] : vector<2x32x256xf32> to vector<2x256xf32>
    %cst_16 = arith.constant 3.200000e+01 : f32
    %35 = vector.broadcast %cst_16 : f32 to vector<2x256xf32>
    %36 = arith.divf %34, %35 : vector<2x256xf32>
    %cst_17 = arith.constant dense<0xFF800000> : vector<2x256xf32>
    %37 = vector.multi_reduction <maximumf>, %33, %cst_17 [1] : vector<2x32x256xf32> to vector<2x256xf32>
    %38 = tpu.concatenate %36, %37 in 1 : vector<2x256xf32>, vector<2x256xf32> -> vector<2x512xf32>
    %c0_18 = arith.constant 0 : index
    %c0_19 = arith.constant 0 : index
    %39 = vector.load %arg6[%c0_18, %c0_19] : memref<512x256xf32, #tpu.memory_space<vmem>>, vector<512x256xf32>
    %cst_20 = arith.constant dense<0.000000e+00> : vector<2x256xf32>
    %40 = tpu.matmul %38, %39, %cst_20 {dimension_numbers = #tpu.dot_dimension_numbers<[1], [0], [0], [1], [0, 0, 1, 1], [], []>} : vector<2x512xf32>, vector<512x256xf32>, vector<2x256xf32> -> vector<2x256xf32>
    %c0_21 = arith.constant 0 : index
    %41 = memref.load %arg7[%c0_21] : memref<1xf32, #tpu.memory_space<smem>>
    %42 = vector.broadcast %41 : f32 to vector<2x256xf32>
    %43 = arith.addf %40, %42 : vector<2x256xf32>
    %44 = arith.negf %43 : vector<2x256xf32>
    %45 = math.exp %44 : vector<2x256xf32>
    %cst_22 = arith.constant 1.000000e+00 : f32
    %46 = vector.broadcast %cst_22 : f32 to vector<2x256xf32>
    %47 = arith.addf %46, %45 : vector<2x256xf32>
    %48 = arith.divf %46, %47 : vector<2x256xf32>
    %49 = vector.shape_cast %48 : vector<2x256xf32> to vector<2x1x256xf32>
    %50 = vector.broadcast %49 : vector<2x1x256xf32> to vector<2x32x256xf32>
    %51 = arith.mulf %50, %33 : vector<2x32x256xf32>
    %c0_23 = arith.constant 0 : index
    %c0_24 = arith.constant 0 : index
    %c0_25 = arith.constant 0 : index
    %52 = vector.load %arg8[%c0_23, %c0_24, %c0_25] : memref<2x32x256xf32, #tpu.memory_space<vmem>>, vector<2x32x256xf32>
    tpu.vector_store %arg8[%c0_23, %c0_24, %c0_25], %51 {strides = array<i32>} : memref<2x32x256xf32, #tpu.memory_space<vmem>>, vector<2x32x256xf32>,
    return
  }
  func.func @transform_0(%arg0: i32) -> (i32, i32, i32) {
    %c0_i32 = arith.constant 0 : i32
    %c0_i32_0 = arith.constant 0 : i32
    %c0_i32_1 = arith.constant 0 : i32
    return %arg0, %c0_i32, %c0_i32_0 : i32, i32, i32
  }
  func.func @transform_1(%arg0: i32) -> (i32, i32) {
    %c0_i32 = arith.constant 0 : i32
    %c0_i32_0 = arith.constant 0 : i32
    %c0_i32_1 = arith.constant 0 : i32
    return %c0_i32, %c0_i32_0 : i32, i32
  }
  func.func @transform_2(%arg0: i32) -> (i32, i32) {
    %c0_i32 = arith.constant 0 : i32
    %c0_i32_0 = arith.constant 0 : i32
    %c0_i32_1 = arith.constant 0 : i32
    return %c0_i32, %c0_i32_0 : i32, i32
  }
  func.func @transform_3(%arg0: i32) -> (i32, i32) {
    %c0_i32 = arith.constant 0 : i32
    %c0_i32_0 = arith.constant 0 : i32
    %c0_i32_1 = arith.constant 0 : i32
    return %c0_i32, %c0_i32_0 : i32, i32
  }
  func.func @transform_4(%arg0: i32) -> (i32, i32) {
    %c0_i32 = arith.constant 0 : i32
    %c0_i32_0 = arith.constant 0 : i32
    %c0_i32_1 = arith.constant 0 : i32
    return %c0_i32, %c0_i32_0 : i32, i32
  }
  func.func @transform_5(%arg0: i32) -> (i32, i32) {
    %c0_i32 = arith.constant 0 : i32
    %c0_i32_0 = arith.constant 0 : i32
    %c0_i32_1 = arith.constant 0 : i32
    return %c0_i32, %c0_i32_0 : i32, i32
  }
  func.func @transform_6(%arg0: i32) -> i32 {
    %c0_i32 = arith.constant 0 : i32
    %c0_i32_0 = arith.constant 0 : i32
    return %c0_i32 : i32
  }
  func.func @transform_7(%arg0: i32) -> (i32, i32, i32) {
    %c0_i32 = arith.constant 0 : i32
    %c0_i32_0 = arith.constant 0 : i32
    %c0_i32_1 = arith.constant 0 : i32
    return %arg0, %c0_i32, %c0_i32_0 : i32, i32, i32
  }
}

module attributes {stable_mosaic.version = 11 : i64} {
  func.func @kernel(%arg0: i32, %arg1: memref<2x32x256xf32, #tpu.memory_space<vmem>>, %arg2: memref<2x32xf32, #tpu.memory_space<vmem>>, %arg3: memref<1x2xf32, #tpu.memory_space<vmem>>, %arg4: memref<2x32xf32, #tpu.memory_space<vmem>>, %arg5: memref<1x32xf32, #tpu.memory_space<vmem>>, %arg6: memref<512x256xf32, #tpu.memory_space<vmem>>, %arg7: memref<1xf32, #tpu.memory_space<smem>>, %arg8: memref<2x32x256xf32, #tpu.memory_space<vmem>>) attributes {dimension_semantics = [#tpu.dimension_semantics<parallel>], iteration_bounds = array<i64: 1>, scalar_prefetch = 0 : i64, scratch_operands = 0 : i64, tpu.core_type = #tpu.core_type<tc>, window_params = [{transform_indices = @transform_0, window_bounds = array<i64: 2, 32, 256>}, {pipeline_mode = #tpu.pipeline_mode<synchronous>, transform_indices = @transform_1, window_bounds = array<i64: 2, 32>}, {pipeline_mode = #tpu.pipeline_mode<synchronous>, transform_indices = @transform_2, window_bounds = array<i64: 1, 2>}, {pipeline_mode = #tpu.pipeline_mode<synchronous>, transform_indices = @transform_3, window_bounds = array<i64: 2, 32>}, {pipeline_mode = #tpu.pipeline_mode<synchronous>, transform_indices = @transform_4, window_bounds = array<i64: 1, 32>}, {pipeline_mode = #tpu.pipeline_mode<synchronous>, transform_indices = @transform_5, window_bounds = array<i64: 512, 256>}, {transform_indices = @transform_6, window_bounds = array<i64: 1>}, {transform_indices = @transform_7, window_bounds = array<i64: 2, 32, 256>}]} {
    %c0 = arith.constant 0 : index
    %c0_0 = arith.constant 0 : index
    %c0_1 = arith.constant 0 : index
    %0 = vector.load %arg1[%c0, %c0_0, %c0_1] : memref<2x32x256xf32, #tpu.memory_space<vmem>>, vector<2x32x256xf32>
    %cst = arith.constant dense<0.000000e+00> : vector<2x32xf32>
    %1 = vector.multi_reduction <add>, %0, %cst [2] : vector<2x32x256xf32> to vector<2x32xf32>
    %cst_2 = arith.constant 2.560000e+02 : f32
    %2 = vector.broadcast %cst_2 : f32 to vector<2x32xf32>
    %3 = arith.divf %1, %2 : vector<2x32xf32>
    %c0_3 = arith.constant 0 : index
    %c0_4 = arith.constant 0 : index
    %4 = vector.load %arg2[%c0_3, %c0_4] : memref<2x32xf32, #tpu.memory_space<vmem>>, vector<2x32xf32>
    %5 = vector.shape_cast %3 : vector<2x32xf32> to vector<2x1x32xf32>
    %6 = vector.shape_cast %4 : vector<2x32xf32> to vector<1x2x32xf32>
    %7 = vector.broadcast %5 : vector<2x1x32xf32> to vector<2x2x32xf32>
    %8 = vector.broadcast %6 : vector<1x2x32xf32> to vector<2x2x32xf32>
    %9 = arith.mulf %7, %8 : vector<2x2x32xf32>
    %cst_5 = arith.constant dense<0.000000e+00> : vector<2x2xf32>
    %10 = vector.multi_reduction <add>, %9, %cst_5 [2] : vector<2x2x32xf32> to vector<2x2xf32>
    %c0_6 = arith.constant 0 : index
    %c0_7 = arith.constant 0 : index
    %11 = vector.load %arg3[%c0_6, %c0_7] : memref<1x2xf32, #tpu.memory_space<vmem>>, vector<1x2xf32>
    %12 = vector.broadcast %11 : vector<1x2xf32> to vector<2x2xf32>
    %13 = arith.addf %10, %12 : vector<2x2xf32>
    %cst_8 = arith.constant 0.000000e+00 : f32
    %14 = vector.broadcast %cst_8 : f32 to vector<2x2xf32>
    %15 = arith.maximumf %13, %14 : vector<2x2xf32>
    %c0_9 = arith.constant 0 : index
    %c0_10 = arith.constant 0 : index
    %16 = vector.load %arg4[%c0_9, %c0_10] : memref<2x32xf32, #tpu.memory_space<vmem>>, vector<2x32xf32>
    %17 = vector.shape_cast %15 : vector<2x2xf32> to vector<2x2x1xf32>
    %18 = vector.shape_cast %16 : vector<2x32xf32> to vector<1x2x32xf32>
    %19 = vector.broadcast %17 : vector<2x2x1xf32> to vector<2x2x32xf32>
    %20 = vector.broadcast %18 : vector<1x2x32xf32> to vector<2x2x32xf32>
    %21 = arith.mulf %19, %20 : vector<2x2x32xf32>
    %cst_11 = arith.constant dense<0.000000e+00> : vector<2x32xf32>
    %22 = vector.multi_reduction <add>, %21, %cst_11 [1] : vector<2x2x32xf32> to vector<2x32xf32>
    %c0_12 = arith.constant 0 : index
    %c0_13 = arith.constant 0 : index
    %23 = vector.load %arg5[%c0_12, %c0_13] : memref<1x32xf32, #tpu.memory_space<vmem>>, vector<1x32xf32>
    %24 = vector.broadcast %23 : vector<1x32xf32> to vector<2x32xf32>
    %25 = arith.addf %22, %24 : vector<2x32xf32>
    %26 = arith.negf %25 : vector<2x32xf32>
    %27 = math.exp %26 : vector<2x32xf32>
    %cst_14 = arith.constant 1.000000e+00 : f32
    %28 = vector.broadcast %cst_14 : f32 to vector<2x32xf32>
    %29 = arith.addf %28, %27 : vector<2x32xf32>
    %30 = arith.divf %28, %29 : vector<2x32xf32>
    %31 = vector.shape_cast %30 : vector<2x32xf32> to vector<2x32x1xf32>
    %32 = vector.broadcast %31 : vector<2x32x1xf32> to vector<2x32x256xf32>
    %33 = arith.mulf %0, %32 : vector<2x32x256xf32>
    %cst_15 = arith.constant dense<0.000000e+00> : vector<2x256xf32>
    %34 = vector.multi_reduction <add>, %33, %cst_15 [1] : vector<2x32x256xf32> to vector<2x256xf32>
    %cst_16 = arith.constant 3.200000e+01 : f32
    %35 = vector.broadcast %cst_16 : f32 to vector<2x256xf32>
    %36 = arith.divf %34, %35 : vector<2x256xf32>
    %cst_17 = arith.constant dense<0xFF800000> : vector<2x256xf32>
    %37 = vector.multi_reduction <maximumf>, %33, %cst_17 [1] : vector<2x32x256xf32> to vector<2x256xf32>
    %38 = tpu.concatenate %36, %37 in 1 : vector<2x256xf32>, vector<2x256xf32> -> vector<2x512xf32>
    %c0_18 = arith.constant 0 : index
    %c0_19 = arith.constant 0 : index
    %39 = vector.load %arg6[%c0_18, %c0_19] : memref<512x256xf32, #tpu.memory_space<vmem>>, vector<512x256xf32>
    %cst_20 = arith.constant dense<0.000000e+00> : vector<2x256xf32>
    %40 = tpu.matmul %38, %39, %cst_20 {dimension_numbers = #tpu.dot_dimension_numbers<[1], [0], [0], [1], [0, 0, 1, 1], [], []>} : vector<2x512xf32>, vector<512x256xf32>, vector<2x256xf32> -> vector<2x256xf32>
    %c0_21 = arith.constant 0 : index
    %41 = memref.load %arg7[%c0_21] : memref<1xf32, #tpu.memory_space<smem>>
    %42 = vector.broadcast %41 : f32 to vector<2x256xf32>
    %43 = arith.addf %40, %42 : vector<2x256xf32>
    %44 = arith.negf %43 : vector<2x256xf32>
    %45 = math.exp %44 : vector<2x256xf32>
    %cst_22 = arith.constant 1.000000e+00 : f32
    %46 = vector.broadcast %cst_22 : f32 to vector<2x256xf32>
    %47 = arith.addf %46, %45 : vector<2x256xf32>
    %48 = arith.divf %46, %47 : vector<2x256xf32>
    %49 = vector.shape_cast %48 : vector<2x256xf32> to vector<2x1x256xf32>
    %50 = vector.broadcast %49 : vector<2x1x256xf32> to vector<2x32x256xf32>
    %51 = arith.mulf %50, %33 : vector<2x32x256xf32>
    %c0_23 = arith.constant 0 : index
    %c0_24 = arith.constant 0 : index
    %c0_25 = arith.constant 0 : index
    %52 = vector.load %arg8[%c0_23, %c0_24, %c0_25] : memref<2x32x256xf32, #tpu.memory_space<vmem>>, vector<2x32x256xf32>
    tpu.vector_store %arg8[%c0_23, %c0_24, %c0_25], %51 {strides = array<i32>} : memref<2x32x256xf32, #tpu.memory_space<vmem>>, vector<2x32x256xf32>,
    return
  }
  func.func @transform_0(%arg0: i32) -> (i32, i32, i32) {
    %c0_i32 = arith.constant 0 : i32
    %c0_i32_0 = arith.constant 0 : i32
    %c0_i32_1 = arith.constant 0 : i32
    return %arg0, %c0_i32, %c0_i32_0 : i32, i32, i32
  }
  func.func @transform_1(%arg0: i32) -> (i32, i32) {
    %c0_i32 = arith.constant 0 : i32
    %c0_i32_0 = arith.constant 0 : i32
    %c0_i32_1 = arith.constant 0 : i32
    return %c0_i32, %c0_i32_0 : i32, i32
  }
  func.func @transform_2(%arg0: i32) -> (i32, i32) {
    %c0_i32 = arith.constant 0 : i32
    %c0_i32_0 = arith.constant 0 : i32
    %c0_i32_1 = arith.constant 0 : i32
    return %c0_i32, %c0_i32_0 : i32, i32
  }
  func.func @transform_3(%arg0: i32) -> (i32, i32) {
    %c0_i32 = arith.constant 0 : i32
    %c0_i32_0 = arith.constant 0 : i32
    %c0_i32_1 = arith.constant 0 : i32
    return %c0_i32, %c0_i32_0 : i32, i32
  }
  func.func @transform_4(%arg0: i32) -> (i32, i32) {
    %c0_i32 = arith.constant 0 : i32
    %c0_i32_0 = arith.constant 0 : i32
    %c0_i32_1 = arith.constant 0 : i32
    return %c0_i32, %c0_i32_0 : i32, i32
  }
  func.func @transform_5(%arg0: i32) -> (i32, i32) {
    %c0_i32 = arith.constant 0 : i32
    %c0_i32_0 = arith.constant 0 : i32
    %c0_i32_1 = arith.constant 0 : i32
    return %c0_i32, %c0_i32_0 : i32, i32
  }
  func.func @transform_6(%arg0: i32) -> i32 {
    %c0_i32 = arith.constant 0 : i32
    %c0_i32_0 = arith.constant 0 : i32
    return %c0_i32 : i32
  }
  func.func @transform_7(%arg0: i32) -> (i32, i32, i32) {
    %c0_i32 = arith.constant 0 : i32
    %c0_i32_0 = arith.constant 0 : i32
    %c0_i32_1 = arith.constant 0 : i32
    return %arg0, %c0_i32, %c0_i32_0 : i32, i32, i32
  }
}

</mosaic_0001>

<bundles_post_ra>
// kernel: tpu_custom_call.1
= control target key start
LH: loop header
LB: loop body
LE: loop exit
PB: predicated region body
PF: predicated region fallthrough
CT: control target
= control target key end

     0   :  { %13 = vsyncpa [#allocation4], 0  ;;  %s1283_s0 = inlined_call_operand.hbm [shape: f32[2,32,256], index: 0, kind: input, shape index: {}]   ;;  %s1284_s1 = inlined_call_operand.vmem [shape: f32[2,32], index: 1, kind: input, shape index: {}]   ;;  %s1285_s2 = inlined_call_operand.vmem [shape: f32[1,2], index: 2, kind: input, shape index: {}]   ;;  %s1286_s3 = inlined_call_operand.vmem [shape: f32[2,32], index: 3, kind: input, shape index: {}]   ;;  %s1287_s4 = inlined_call_operand.vmem [shape: f32[1,32], index: 4, kind: input, shape index: {}]   ;;  %s1288_s5 = inlined_call_operand.hbm [shape: f32[512,256], index: 5, kind: input, shape index: {}]   ;;  %s1289_s6 = inlined_call_operand.<no memory space> [shape: f32[1], index: 6, kind: input, shape index: {}]   ;;  %s1290_s7 = inlined_call_operand.hbm [shape: f32[2,32,256], index: 7, kind: output, shape index: {}]  }
   0x1   :  { %14 = vsyncpa [#allocation7], 0 }
   0x2   :  { %15 = vsyncpa [#allocation5], 0  ;;  %s1014_s24 = smov [#allocation3]  }
   0x3   :  { %s21_s25 = sshll.u32 %s1014_s24, 4  ;;  %s22_s25 = int_to_ptr.vmem [resolvable:$true] %s21_s25 }
   0x4   :  { %s956_s26 = scalar_lea.vmem %s22_s25, 2048  ;;  %p961_p1 = scmp.lt.s32.totalorder %s22_s25, %s22_s25 }
   0x5   :  { %p957_p0 = scmp.ne.s32.totalorder %s22_s25, %s956_s26  ;;  %p962_p2 = scmp.lt.s32.totalorder %s956_s26, %s956_s26 }
   0x7   :  { %p963_p3 = por %p962_p2, %p961_p1 }
   0x9   :  { %p964_p4 = pnand %p963_p3, %p957_p0 }
   0xb   :  { %967 = shalt.err (!%p964_p4)
}
   0xc   :  { %s1015_s27 = smov 256   ;;  %s1016_s28 = smov 16  }
   0xd   :  { %27 = dma.hbm_to_vmem [thread:$0]  %s1283_s0, 2048, %s22_s25, [#allocation4], %s1015_s27, %s1015_s27, %s1016_s28  }
   0xe   :  { %s1017_s8 = smov [#allocation6]  }
   0xf   :  { %s41_s9 = sshll.u32 %s1017_s8, 4  ;;  %s42_s9 = int_to_ptr.vmem [resolvable:$true] %s41_s9 }
  0x10   :  { %s976_s10 = scalar_lea.vmem %s42_s9, 16384  ;;  %p981_p6 = scmp.lt.s32.totalorder %s42_s9, %s42_s9 }
  0x11   :  { %p977_p5 = scmp.ne.s32.totalorder %s42_s9, %s976_s10  ;;  %p982_p7 = scmp.lt.s32.totalorder %s976_s10, %s976_s10 }
  0x13   :  { %p983_p8 = por %p982_p7, %p981_p6 }
  0x15   :  { %p984_p9 = pnand %p983_p8, %p977_p5 }
  0x17   :  { %987 = shalt.err (!%p984_p9)
}
  0x18   :  { %47 = dma.hbm_to_vmem [thread:$0]  %s1288_s5, 16384, %s42_s9, [#allocation7], %s1015_s27, %s1015_s27, %s1016_s28  }
  0x19   :  { %1008 = dma.done.wait [#allocation4], 2048  }
  0x1a   :  { %1009 = vsyncadd [#allocation4], 4294965248 }
  0x1b   :  { %1010 = dma.done.wait [#allocation7], 16384  }
  0x1c   :  { %1011 = vsyncadd [#allocation7], 4294950912  ;;  %v1073_v0 = vld [vmem:[#allocation3 + $0x40] sm:$0xff]  ;;  %v1075_v1 = vld [vmem:[#allocation3 + $0x48] sm:$0xff]  ;;  %v107_v24 = vlaneseq  ;;  %v1018_v30 = vmov 0   ;;  %vm244_vm0 = vcmask 130112  }
  0x1d   :  { %v1077_v2 = vld [vmem:[#allocation3] sm:$0xff]  ;;  %v84_v3 = vadd.f32 %v1075_v1, %v1073_v0  ;;  %v1081_v4 = vld [vmem:[#allocation3 + $0x8] sm:$0xff]  ;;  %v1083_v5 = vld [vmem:[#allocation3 + $0x50] sm:$0xff]  ;;  %931 = vset.pattern.permute.xlu1 %v1018_v30  ;;  %930 = vset.pattern.permute.xlu0 %v1018_v30  ;;  %vm251_vm1 = vcmask 195712   ;;  %vm258_vm2 = vcmask 261312   ;;  %vm317_vm3 = vcmask 1041409  }
  0x1e   :  { %v1085_v6 = vld [vmem:[#allocation3 + $0x58] sm:$0xff]  ;;  %v72_v7 = vadd.f32 %v1081_v4, %v1077_v2  ;;  %v1089_v8 = vld [vmem:[#allocation3 + $0x10] sm:$0xff]  ;;  %v1097_v12 = vld [vmem:[#allocation3 + $0x60] sm:$0xff]  ;;  %v1122_v25 = vshrl.u32 %v107_v24, 7  ;;  %vm322_vm4 = vcmask 254976  }
  0x1f   :  { %v1091_v9 = vld [vmem:[#allocation3 + $0x18] sm:$0xff]  ;;  %85 = vadd.xlane.f32.xlu1 %v84_v3  ;;  %v87_v10 = vadd.f32 %v1085_v6, %v1083_v5  ;;  %v1099_v13 = vld [vmem:[#allocation3 + $0x68] sm:$0xff]  ;;  %v1101_v14 = vld [vmem:[#allocation3 + $0x20] sm:$0xff] }
  0x20   :  { %73 = vadd.xlane.f32.xlu0 %v72_v7  ;;  %v75_v11 = vadd.f32 %v1091_v9, %v1089_v8  ;;  %v1103_v15 = vld [vmem:[#allocation3 + $0x28] sm:$0xff]  ;;  %v90_v16 = vadd.f32 %v1099_v13, %v1097_v12  ;;  %v1109_v18 = vld [vmem:[#allocation3 + $0x70] sm:$0xff]  ;;  %v1111_v19 = vld [vmem:[#allocation3 + $0x78] sm:$0xff]  ;;  %v1125_v26 = vsub.s32 0, %v1122_v25  ;;  %v1132_v29 = vsub.s32 1, %v1122_v25 }
  0x21   :  { %v78_v17 = vadd.f32 %v1103_v15, %v1101_v14  ;;  %v1113_v20 = vld [vmem:[#allocation3 + $0x30] sm:$0xff]  ;;  %v1115_v21 = vld [vmem:[#allocation3 + $0x38] sm:$0xff]  ;;  %v93_v22 = vadd.f32 %v1111_v19, %v1109_v18  ;;  %v105_v27 = vld [vmem:[%s1284_s1] sm:$0x3] }
  0x22   :  { %v81_v23 = vadd.f32 %v1115_v21, %v1113_v20  ;;  %v110_v28 = vrot.slane %v105_v27, %v1125_v26  ;;  %v129_v31 = vrot.slane %v105_v27, %v1132_v29 }
  0x23   :  { %88 = vadd.xlane.f32.xlu1 %v87_v10 }
  0x24   :  { %76 = vadd.xlane.f32.xlu0 %v75_v11 }
  0x27   :  { %91 = vadd.xlane.f32.xlu1 %v90_v16 }
  0x28   :  { %79 = vadd.xlane.f32.xlu0 %v78_v17 }
  0x2b   :  { %94 = vadd.xlane.f32.xlu1 %v93_v22 }
  0x2c   :  { %82 = vadd.xlane.f32.xlu0 %v81_v23 }
  0x3c   :  { %116 = vbcast.lane.b32.xlu1 %v110_v28, 264 }
  0x40   :  { %131 = vbcast.lane.b32.xlu1 %v129_v31, 256 }
  0x42   :  { %112 = vbcast.lane.b32.xlu0 %v110_v28, 256 }
  0x44   :  { %135 = vbcast.lane.b32.xlu1 %v129_v31, 264 }
  0x46   :  { %120 = vbcast.lane.b32.xlu0 %v110_v28, 272 }
  0x48   :  { %139 = vbcast.lane.b32.xlu1 %v129_v31, 272 }
  0x4a   :  { %124 = vbcast.lane.b32.xlu0 %v110_v28, 280 }
  0x4c   :  { %143 = vbcast.lane.b32.xlu1 %v129_v31, 280 }
  0xa8   :  { %v86_v32 = vpop.xlane.xlu1 %85 }
  0xa9   :  { %v74_v33 = vpop.xlane.xlu0 %73  ;;  %v101_v48 = vmul.f32 0.00390625, %v86_v32 }
  0xaa   :  { %v97_v41 = vmul.f32 0.00390625, %v74_v33  ;;  %v234_v33 = vand.u32 127, %v107_v24 }
  0xac   :  { %v89_v34 = vpop.xlane.xlu1 %88 }
  0xad   :  { %v77_v35 = vpop.xlane.xlu0 %76  ;;  %v102_v52 = vmul.f32 0.00390625, %v89_v34 }
  0xae   :  { %v98_v40 = vmul.f32 0.00390625, %v77_v35 }
  0xb0   :  { %v92_v36 = vpop.xlane.xlu1 %91 }
  0xb1   :  { %v80_v37 = vpop.xlane.xlu0 %79  ;;  %v103_v60 = vmul.f32 0.00390625, %v92_v36  ;;  %v239_v36 = vadd.s32 4294967288, %v234_v33 }
  0xb2   :  { %v99_v56 = vmul.f32 0.00390625, %v80_v37 }
  0xb4   :  { %v95_v38 = vpop.xlane.xlu1 %94 }
  0xb5   :  { %v83_v39 = vpop.xlane.xlu0 %82  ;;  %v104_v16 = vmul.f32 0.00390625, %v95_v38 }
  0xb6   :  { %v100_v3 = vmul.f32 0.00390625, %v83_v39  ;;  %v246_v39 = vadd.s32 4294967280, %v234_v33 }
  0xb8   :  { %v117_v42 = vpop.permute.xlu1 %116 }
  0xb9   :  { %v154_v43 = vmul.f32 %v117_v42, %v98_v40  ;;  %v113_v44 = vpop.permute.xlu0 %112  ;;  %v162_v53 = vmul.f32 %v117_v42, %v102_v52  ;;  %v237_v42 = vsub.s32 %v234_v33, %v1122_v25 }
  0xba   :  { %v153_v45 = vmul.f32 %v113_v44, %v97_v41  ;;  %v161_v50 = vmul.f32 %v113_v44, %v101_v48 }
  0xbb   :  { %189 = vperm.xlu1 %931, %v154_v43  }
  0xbc   :  { %186 = vperm.xlu0 %930, %v153_v45   ;;  %v132_v46 = vpop.permute.xlu1 %131  ;;  %v249_v45 = vsub.s32 %v246_v39, %v1122_v25  ;;  %v917_v39 = vld [vmem:[%s1285_s2] ss:$0 sm:$0xff] }
  0xbd   :  { %v157_v47 = vmul.f32 %v132_v46, %v97_v41  ;;  %v165_v54 = vmul.f32 %v132_v46, %v101_v48  ;;  %v121_v55 = vpop.permute.xlu0 %120  ;;  %v242_v41 = vsub.s32 %v239_v36, %v1122_v25 }
  0xbe   :  { %v155_v57 = vmul.f32 %v121_v55, %v99_v56  ;;  %v163_v61 = vmul.f32 %v121_v55, %v103_v60 }
  0xbf   :  { %198 = vperm.xlu1 %931, %v157_v47  }
  0xc0   :  { %v136_v49 = vpop.permute.xlu1 %135 }
  0xc1   :  { %v158_v51 = vmul.f32 %v136_v49, %v98_v40  ;;  %v166_v58 = vmul.f32 %v136_v49, %v102_v52  ;;  %v125_v63 = vpop.permute.xlu0 %124  ;;  %v253_v40 = vadd.s32 4294967272, %v234_v33 }
  0xc2   :  { %v156_v7 = vmul.f32 %v125_v63, %v100_v3  ;;  %v164_v17 = vmul.f32 %v125_v63, %v104_v16 }
  0xc3   :  { %210 = vperm.xlu1 %931, %v161_v50   ;;  %201 = vperm.xlu0 %930, %v158_v51   ;;  %v256_v46 = vsub.s32 %v253_v40, %v1122_v25 }
  0xc4   :  { %v140_v59 = vpop.permute.xlu1 %139 }
  0xc5   :  { %v159_v62 = vmul.f32 %v140_v59, %v99_v56  ;;  %v167_v10 = vmul.f32 %v140_v59, %v103_v60 }
  0xc7   :  { %222 = vperm.xlu1 %931, %v165_v54   ;;  %213 = vperm.xlu0 %930, %v162_v53  }
  0xc8   :  { %v144_v11 = vpop.permute.xlu1 %143 }
  0xc9   :  { %v160_v22 = vmul.f32 %v144_v11, %v100_v3  ;;  %v168_v23 = vmul.f32 %v144_v11, %v104_v16 }
  0xcb   :  { %225 = vperm.xlu0 %930, %v166_v58   ;;  %192 = vperm.xlu1 %931, %v155_v57  }
  0xcf   :  { %204 = vperm.xlu0 %930, %v159_v62   ;;  %216 = vperm.xlu1 %931, %v163_v61  }
  0xd3   :  { %228 = vperm.xlu0 %930, %v167_v10   ;;  %195 = vperm.xlu1 %931, %v156_v7  }
  0xd7   :  { %207 = vperm.xlu0 %930, %v160_v22   ;;  %219 = vperm.xlu1 %931, %v164_v17  }
  0xdb   :  { %231 = vperm.xlu0 %930, %v168_v23  }
 0x136   :  { %v190_v27 = vpop.permute.xlu1 %189 }
 0x137   :  { %v187_v28 = vpop.permute.xlu0 %186  ;;  %v243_v47 = vrot.slane %v190_v27, %v242_v41 }
 0x138   :  { %v238_v48 = vrot.slane %v187_v28, %v237_v42 }
 0x13a   :  { %v199_v30 = vpop.permute.xlu1 %198  ;;  %v245_v55 = vsel %vm244_vm0, %v243_v47, %v238_v48  ;;  %v633_v47 = vld [vmem:[#allocation6 + $0x2f8] sm:$0xff]  ;;  %v632_v48 = vld [vmem:[#allocation6 + $0x2f0] sm:$0xff] }
 0x13b   :  { %v263_v53 = vrot.slane %v199_v30, %v237_v42  ;;  %739 = vmatprep.subr.mxu1 %v633_v47  ;;  %v547_v47 = vld [vmem:[#allocation6 + $0x48] sm:$0xff] }
 0x13c   :  { %740 = vmatpush1.msra.mxu1 %v632_v48  ;;  %v610_v48 = vld [vmem:[#allocation6 + $0x240] sm:$0xff] }
 0x13e   :  { %v211_v31 = vpop.permute.xlu1 %210  ;;  %v202_v32 = vpop.permute.xlu0 %201 }
 0x13f   :  { %v267_v50 = vrot.slane %v202_v32, %v242_v41  ;;  %v282_v56 = vrot.slane %v211_v31, %v237_v42 }
 0x141   :  { %v268_v59 = vsel %vm244_vm0, %v267_v50, %v263_v53  ;;  %v568_v50 = vld [vmem:[#allocation6 + $0xf0] sm:$0xff]  ;;  %v629_v53 = vld [vmem:[#allocation6 + $0x2d8] sm:$0xff] }
 0x142   :  { %v223_v34 = vpop.permute.xlu1 %222  ;;  %v214_v35 = vpop.permute.xlu0 %213 }
 0x143   :  { %v286_v60 = vrot.slane %v214_v35, %v242_v41  ;;  %v301_v11 = vrot.slane %v223_v34, %v237_v42 }
 0x145   :  { %v287_v28 = vsel %vm244_vm0, %v286_v60, %v282_v56  ;;  %v565_v56 = vld [vmem:[#allocation6 + $0xd8] sm:$0xff]  ;;  %v626_v60 = vld [vmem:[#allocation6 + $0x2c0] sm:$0xff] }
 0x146   :  { %v193_v37 = vpop.permute.xlu1 %192  ;;  %v226_v38 = vpop.permute.xlu0 %225 }
 0x147   :  { %v250_v51 = vrot.slane %v193_v37, %v249_v45  ;;  %v305_v61 = vrot.slane %v226_v38, %v242_v41 }
 0x149   :  { %v252_v63 = vsel %vm251_vm1, %v250_v51, %v245_v55  ;;  %v306_v30 = vsel %vm244_vm0, %v305_v61, %v301_v11  ;;  %v630_v51 = vld [vmem:[#allocation6 + $0x2e0] sm:$0xff]  ;;  %v628_v55 = vld [vmem:[#allocation6 + $0x2d0] sm:$0xff]  ;;  %v559_v11 = vld [vmem:[#allocation6 + $0xa8] sm:$0xff] }
 0x14a   :  { %v217_v43 = vpop.permute.xlu1 %216  ;;  %v205_v44 = vpop.permute.xlu0 %204  ;;  %v562_v61 = vld [vmem:[#allocation6 + $0xc0] sm:$0xff] }
 0x14b   :  { %v272_v52 = vrot.slane %v205_v44, %v249_v45  ;;  %v291_v3 = vrot.slane %v217_v43, %v249_v45 }
 0x14d   :  { %v273_v7 = vsel %vm251_vm1, %v272_v52, %v268_v59  ;;  %v292_v33 = vsel %vm251_vm1, %v291_v3, %v287_v28  ;;  %v567_v52 = vld [vmem:[#allocation6 + $0xe8] sm:$0xff]  ;;  %v624_v3 = vld [vmem:[#allocation6 + $0x2b0] sm:$0xff] }
 0x14e   :  { %v196_v24 = vpop.permute.xlu1 %195  ;;  %v229_v49 = vpop.permute.xlu0 %228  ;;  %v563_v59 = vld [vmem:[#allocation6 + $0xc8] sm:$0xff]  ;;  %v556_v28 = vld [vmem:[#allocation6 + $0x90] sm:$0xff] }
 0x14f   :  { %v257_v54 = vrot.slane %v196_v24, %v256_v46  ;;  %v310_v10 = vrot.slane %v229_v49, %v249_v45  ;;  %v569_v24 = vld [vmem:[#allocation6 + $0xf8] sm:$0xff]  ;;  %v631_v49 = vld [vmem:[#allocation6 + $0x2e8] sm:$0xff] }
 0x150   :  { %668 = vmatprep.subr.mxu0 %v569_v24  ;;  %741 = vmatprep.subr.mxu1 %v631_v49  ;;  %v546_v24 = vld [vmem:[#allocation6 + $0x40] sm:$0xff]  ;;  %v609_v49 = vld [vmem:[#allocation6 + $0x238] sm:$0xff] }
 0x151   :  { %v259_v17 = vsel %vm258_vm2, %v257_v54, %v252_v63  ;;  %v311_v35 = vsel %vm251_vm1, %v310_v10, %v306_v30  ;;  %669 = vmatpush1.msra.mxu0 %v568_v50  ;;  %v566_v54 = vld [vmem:[#allocation6 + $0xe0] sm:$0xff]  ;;  %742 = vmatpush1.msra.mxu1 %v630_v51  ;;  %v561_v63 = vld [vmem:[#allocation6 + $0xb8] sm:$0xff]  ;;  %v623_v10 = vld [vmem:[#allocation6 + $0x2a8] sm:$0xff] }
 0x152   :  { %v220_v57 = vpop.permute.xlu1 %219  ;;  %v208_v58 = vpop.permute.xlu0 %207  ;;  %670 = vmatprep.subr.mxu0 %v567_v52  ;;  %743 = vmatprep.subr.mxu1 %v629_v53  ;;  %v619_v30 = vld [vmem:[#allocation6 + $0x288] sm:$0xff]  ;;  %v545_v50 = vld [vmem:[#allocation6 + $0x38] sm:$0xff]  ;;  %v608_v51 = vld [vmem:[#allocation6 + $0x230] sm:$0xff] }
 0x153   :  { %v277_v62 = vrot.slane %v208_v58, %v256_v46  ;;  %v296_v16 = vrot.slane %v220_v57, %v256_v46  ;;  %671 = vmatpush1.msra.mxu0 %v566_v54  ;;  %v627_v57 = vld [vmem:[#allocation6 + $0x2c8] sm:$0xff]  ;;  %v564_v58 = vld [vmem:[#allocation6 + $0xd0] sm:$0xff]  ;;  %744 = vmatpush1.msra.mxu1 %v628_v55  ;;  %v606_v55 = vld [vmem:[#allocation6 + $0x220] sm:$0xff] }
 0x154   :  { %672 = vmatprep.subr.mxu0 %v565_v56  ;;  %745 = vmatprep.subr.mxu1 %v627_v57  ;;  %v544_v52 = vld [vmem:[#allocation6 + $0x30] sm:$0xff]  ;;  %v607_v53 = vld [vmem:[#allocation6 + $0x228] sm:$0xff]  ;;  %v542_v56 = vld [vmem:[#allocation6 + $0x20] sm:$0xff] }
 0x155   :  { %v278_v22 = vsel %vm258_vm2, %v277_v62, %v273_v7  ;;  %v297_v34 = vsel %vm258_vm2, %v296_v16, %v292_v33  ;;  %673 = vmatpush1.msra.mxu0 %v564_v58  ;;  %v625_v62 = vld [vmem:[#allocation6 + $0x2b8] sm:$0xff]  ;;  %v560_v7 = vld [vmem:[#allocation6 + $0xb0] sm:$0xff]  ;;  %746 = vmatpush1.msra.mxu1 %v626_v60  ;;  %v622_v16 = vld [vmem:[#allocation6 + $0x2a0] sm:$0xff] }
 0x156   :  { %v232_v23 = vpop.permute.xlu0 %231  ;;  %v318_v27 = vsel %vm317_vm3, %v278_v22, %v259_v17  ;;  %674 = vmatprep.subr.mxu0 %v563_v59  ;;  %747 = vmatprep.subr.mxu1 %v625_v62  ;;  %v558_v17 = vld [vmem:[#allocation6 + $0xa0] sm:$0xff]  ;;  %v621_v22 = vld [vmem:[#allocation6 + $0x298] sm:$0xff]  ;;  %v543_v54 = vld [vmem:[#allocation6 + $0x28] sm:$0xff] }
 0x157   :  { %v315_v31 = vrot.slane %v232_v23, %v256_v46  ;;  %v323_v32 = vsel %vm322_vm4, %v318_v27, 0.0  ;;  %675 = vmatpush1.msra.mxu0 %v562_v61  ;;  %748 = vmatpush1.msra.mxu1 %v624_v3  ;;  %v557_v23 = vld [vmem:[#allocation6 + $0x98] sm:$0xff]  ;;  %v620_v27 = vld [vmem:[#allocation6 + $0x290] sm:$0xff]  ;;  %v554_v33 = vld [vmem:[#allocation6 + $0x80] sm:$0xff] }
 0x158   :  { %324 = vadd.xlane.f32.xlu1 %v323_v32  ;;  %676 = vmatprep.subr.mxu0 %v561_v63  ;;  %v618_v32 = vld [vmem:[#allocation6 + $0x280] sm:$0xff]  ;;  %v605_v57 = vld [vmem:[#allocation6 + $0x218] sm:$0xff]  ;;  %v604_v59 = vld [vmem:[#allocation6 + $0x210] sm:$0xff] }
 0x159   :  { %v316_v36 = vsel %vm258_vm2, %v315_v31, %v311_v35  ;;  %677 = vmatpush1.msra.mxu0 %v560_v7  ;;  %749 = vmatprep.subr.mxu1 %v623_v10  ;;  %v555_v31 = vld [vmem:[#allocation6 + $0x88] sm:$0xff]  ;;  %v617_v35 = vld [vmem:[#allocation6 + $0x278] sm:$0xff]  ;;  %v540_v60 = vld [vmem:[#allocation6 + $0x10] sm:$0xff] }
 0x15a   :  { %v319_v37 = vsel %vm317_vm3, %v316_v36, %v297_v34  ;;  %678 = vmatprep.subr.mxu0 %v559_v11  ;;  %750 = vmatpush1.msra.mxu1 %v622_v16  ;;  %v553_v34 = vld [vmem:[#allocation6 + $0x78] sm:$0xff]  ;;  %v616_v36 = vld [vmem:[#allocation6 + $0x270] sm:$0xff]  ;;  %v603_v61 = vld [vmem:[#allocation6 + $0x208] sm:$0xff] }
 0x15b   :  { %v326_v38 = vsel %vm322_vm4, %v319_v37, 0.0  ;;  %679 = vmatpush1.msra.mxu0 %v558_v17  ;;  %751 = vmatprep.subr.mxu1 %v621_v22  ;;  %v552_v37 = vld [vmem:[#allocation6 + $0x70] sm:$0xff]  ;;  %v541_v58 = vld [vmem:[#allocation6 + $0x18] sm:$0xff]  ;;  %v539_v62 = vld [vmem:[#allocation6 + $0x8] sm:$0xff] }
 0x15c   :  { %327 = vadd.xlane.f32.xlu0 %v326_v38  ;;  %680 = vmatprep.subr.mxu0 %v557_v23  ;;  %v615_v38 = vld [vmem:[#allocation6 + $0x268] sm:$0xff]  ;;  %v602_v63 = vld [vmem:[#allocation6 + $0x200] sm:$0xff]  ;;  %v665_v7 = vld [vmem:[#allocation6 + $0x3f8] sm:$0xff] }
 0x15d   :  { %752 = vmatpush1.msra.mxu1 %v620_v27  ;;  %681 = vmatpush1.msra.mxu0 %v556_v28  ;;  %v538_v3 = vld [vmem:[#allocation6] sm:$0xff]  ;;  %v664_v10 = vld [vmem:[#allocation6 + $0x3f0] sm:$0xff] }
 0x15e   :  { %753 = vmatprep.subr.mxu1 %v619_v30  ;;  %682 = vmatprep.subr.mxu0 %v555_v31  ;;  %v343_v11 = vld [vmem:[%s1286_s3] sm:$0x3] }
 0x15f   :  { %754 = vmatpush1.msra.mxu1 %v618_v32  ;;  %683 = vmatpush1.msra.mxu0 %v554_v33 }
 0x160   :  { %755 = vmatprep.subr.mxu1 %v617_v35  ;;  %684 = vmatprep.subr.mxu0 %v553_v34 }
 0x161   :  { %756 = vmatpush1.msra.mxu1 %v616_v36  ;;  %685 = vmatpush1.msra.mxu0 %v552_v37 }
 0x162   :  { %757 = vmatprep.subr.mxu1 %v615_v38  ;;  %v918_v38 = vld [vmem:[%s1287_s4] ss:$0 sm:$0xff] }
 0x172   :  { %336 = vbcast.lane.b32.xlu0 %v917_v39, 256  ;;  %v551_v39 = vld [vmem:[#allocation6 + $0x68] sm:$0xff] }
 0x173   :  { %686 = vmatprep.subr.mxu0 %v551_v39 }
 0x1e1   :  { %v325_v41 = vpop.xlane.xlu1 %324 }
 0x1e5   :  { %v328_v40 = vpop.xlane.xlu0 %327 }
 0x1e9   :  { %v337_v42 = vpop.permute.xlu0 %336 }
 0x1ea   :  { %v339_v43 = vadd.f32 %v337_v42, %v325_v41  ;;  %v340_v44 = vadd.f32 %v337_v42, %v328_v40  ;;  %v614_v40 = vld [vmem:[#allocation6 + $0x260] sm:$0xff]  ;;  %v613_v42 = vld [vmem:[#allocation6 + $0x258] sm:$0xff] }
 0x1eb   :  { %v550_v41 = vld [vmem:[#allocation6 + $0x60] sm:$0xff]  ;;  %758 = vmatpush1.msra.mxu1 %v614_v40 }
 0x1ec   :  { %v341_v45 = vmax.f32 %v339_v43, 0.0  ;;  %v342_v46 = vmax.f32 %v340_v44, 0.0  ;;  %v549_v43 = vld [vmem:[#allocation6 + $0x58] sm:$0xff]  ;;  %v612_v44 = vld [vmem:[#allocation6 + $0x250] sm:$0xff]  ;;  %687 = vmatpush1.msra.mxu0 %v550_v41  ;;  %759 = vmatprep.subr.mxu1 %v613_v42 }
 0x1ed   :  { %688 = vmatprep.subr.mxu0 %v549_v43  ;;  %760 = vmatpush1.msra.mxu1 %v612_v44 }
 0x1ee   :  { %346 = vperm.xlu1 %931, %v341_v45   ;;  %v548_v45 = vld [vmem:[#allocation6 + $0x50] sm:$0xff] }
 0x1ef   :  { %689 = vmatpush1.msra.mxu0 %v548_v45 }
 0x1f0   :  { %690 = vmatprep.subr.mxu0 %v547_v47 }
 0x1f1   :  { %691 = vmatpush1.msra.mxu0 %v546_v24 }
 0x1f2   :  { %351 = vperm.xlu1 %931, %v342_v46   ;;  %v611_v46 = vld [vmem:[#allocation6 + $0x248] sm:$0xff]  ;;  %692 = vmatprep.subr.mxu0 %v545_v50  ;;  %v601_v50 = vld [vmem:[#allocation6 + $0x1f8] sm:$0xff] }
 0x1f3   :  { %761 = vmatprep.subr.mxu1 %v611_v46  ;;  %693 = vmatpush1.msra.mxu0 %v544_v52  ;;  %v600_v52 = vld [vmem:[#allocation6 + $0x1f0] sm:$0xff] }
 0x1f4   :  { %762 = vmatpush1.msra.mxu1 %v610_v48  ;;  %694 = vmatprep.subr.mxu0 %v543_v54  ;;  %v599_v54 = vld [vmem:[#allocation6 + $0x1e8] sm:$0xff] }
 0x1f5   :  { %763 = vmatprep.subr.mxu1 %v609_v49  ;;  %695 = vmatpush1.msra.mxu0 %v542_v56  ;;  %v598_v56 = vld [vmem:[#allocation6 + $0x1e0] sm:$0xff] }
 0x1f6   :  { %764 = vmatpush1.msra.mxu1 %v608_v51  ;;  %696 = vmatprep.subr.mxu0 %v541_v58  ;;  %v663_v51 = vld [vmem:[#allocation6 + $0x3e8] sm:$0xff]  ;;  %v597_v58 = vld [vmem:[#allocation6 + $0x1d8] sm:$0xff] }
 0x1f7   :  { %765 = vmatprep.subr.mxu1 %v607_v53  ;;  %697 = vmatpush1.msra.mxu0 %v540_v60  ;;  %v662_v53 = vld [vmem:[#allocation6 + $0x3e0] sm:$0xff]  ;;  %v596_v60 = vld [vmem:[#allocation6 + $0x1d0] sm:$0xff] }
 0x1f8   :  { %766 = vmatpush1.msra.mxu1 %v606_v55  ;;  %698 = vmatprep.subr.mxu0 %v539_v62  ;;  %v661_v55 = vld [vmem:[#allocation6 + $0x3d8] sm:$0xff]  ;;  %v595_v62 = vld [vmem:[#allocation6 + $0x1c8] sm:$0xff] }
 0x1f9   :  { %767 = vmatprep.subr.mxu1 %v605_v57  ;;  %699 = vmatpush1.msra.mxu0 %v538_v3  ;;  %v660_v57 = vld [vmem:[#allocation6 + $0x3d0] sm:$0xff]  ;;  %v594_v3 = vld [vmem:[#allocation6 + $0x1c0] sm:$0xff] }
 0x1fa   :  { %768 = vmatpush1.msra.mxu1 %v604_v59  ;;  %700 = vmatprep.subr.mxu0 %v601_v50  ;;  %v659_v59 = vld [vmem:[#allocation6 + $0x3c8] sm:$0xff] }
 0x1fb   :  { %769 = vmatprep.subr.mxu1 %v603_v61  ;;  %701 = vmatpush2.msra.mxu0 %v600_v52  ;;  %v658_v61 = vld [vmem:[#allocation6 + $0x3c0] sm:$0xff]  ;;  %v643_v50 = vld [vmem:[#allocation6 + $0x348] sm:$0xff] }
 0x1fc   :  { %770 = vmatpush1.msra.mxu1 %v602_v63  ;;  %702 = vmatprep.subr.mxu0 %v599_v54  ;;  %v657_v63 = vld [vmem:[#allocation6 + $0x3b8] sm:$0xff]  ;;  %v642_v52 = vld [vmem:[#allocation6 + $0x340] sm:$0xff] }
 0x1fd   :  { %771 = vmatprep.subr.mxu1 %v665_v7  ;;  %703 = vmatpush2.msra.mxu0 %v598_v56  ;;  %v656_v7 = vld [vmem:[#allocation6 + $0x3b0] sm:$0xff]  ;;  %v641_v54 = vld [vmem:[#allocation6 + $0x338] sm:$0xff] }
 0x1fe   :  { %772 = vmatpush2.msra.mxu1 %v664_v10  ;;  %704 = vmatprep.subr.mxu0 %v597_v58  ;;  %v593_v10 = vld [vmem:[#allocation6 + $0x1b8] sm:$0xff]  ;;  %v640_v56 = vld [vmem:[#allocation6 + $0x330] sm:$0xff]  ;;  %v639_v58 = vld [vmem:[#allocation6 + $0x328] sm:$0xff] }
 0x1ff   :  { %773 = vmatprep.subr.mxu1 %v663_v51  ;;  %705 = vmatpush2.msra.mxu0 %v596_v60  ;;  %v580_v51 = vld [vmem:[#allocation6 + $0x150] sm:$0xff]  ;;  %v638_v60 = vld [vmem:[#allocation6 + $0x320] sm:$0xff] }
 0x200   :  { %774 = vmatpush2.msra.mxu1 %v662_v53  ;;  %706 = vmatprep.subr.mxu0 %v595_v62  ;;  %v579_v53 = vld [vmem:[#allocation6 + $0x148] sm:$0xff]  ;;  %v637_v62 = vld [vmem:[#allocation6 + $0x318] sm:$0xff] }
 0x201   :  { %775 = vmatprep.subr.mxu1 %v661_v55  ;;  %707 = vmatpush2.msra.mxu0 %v594_v3  ;;  %v578_v55 = vld [vmem:[#allocation6 + $0x140] sm:$0xff]  ;;  %v636_v3 = vld [vmem:[#allocation6 + $0x310] sm:$0xff] }
 0x202   :  { %776 = vmatpush2.msra.mxu1 %v660_v57  ;;  %708 = vmatprep.subr.mxu0 %v593_v10  ;;  %v577_v57 = vld [vmem:[#allocation6 + $0x138] sm:$0xff]  ;;  %v635_v10 = vld [vmem:[#allocation6 + $0x308] sm:$0xff] }
 0x203   :  { %777 = vmatprep.subr.mxu1 %v659_v59  ;;  %v576_v59 = vld [vmem:[#allocation6 + $0x130] sm:$0xff] }
 0x204   :  { %778 = vmatpush2.msra.mxu1 %v658_v61  ;;  %v575_v61 = vld [vmem:[#allocation6 + $0x128] sm:$0xff] }
 0x205   :  { %779 = vmatprep.subr.mxu1 %v657_v63  ;;  %v574_v63 = vld [vmem:[#allocation6 + $0x120] sm:$0xff] }
 0x206   :  { %780 = vmatpush2.msra.mxu1 %v656_v7  ;;  %v573_v7 = vld [vmem:[#allocation6 + $0x118] sm:$0xff] }
 0x269   :  { %v347_v16 = vpop.permute.xlu1 %346 }
 0x26a   :  { %v354_v17 = vmul.f32 %v347_v16, %v343_v11  ;;  %v592_v16 = vld [vmem:[#allocation6 + $0x1b0] sm:$0xff] }
 0x26b   :  { %709 = vmatpush2.msra.mxu0 %v592_v16  ;;  %v634_v16 = vld [vmem:[#allocation6 + $0x300] sm:$0xff] }
 0x26c   :  { %v356_v22 = vsel %vm322_vm4, %v354_v17, 0.0  ;;  %v654_v17 = vld [vmem:[#allocation6 + $0x3a0] sm:$0xff] }
 0x26d   :  { %v357_v23 = vrot.slane %v356_v22, 4  ;;  %v352_v27 = vpop.permute.xlu1 %351 }
 0x26e   :  { %v355_v28 = vmul.f32 %v352_v27, %v343_v11  ;;  %v655_v11 = vld [vmem:[#allocation6 + $0x3a8] sm:$0xff]  ;;  %v653_v27 = vld [vmem:[#allocation6 + $0x398] sm:$0xff] }
 0x26f   :  { %v358_v30 = vadd.f32 %v357_v23, %v356_v22  ;;  %781 = vmatprep.subr.mxu1 %v655_v11  ;;  %v591_v23 = vld [vmem:[#allocation6 + $0x1a8] sm:$0xff]  ;;  %v572_v11 = vld [vmem:[#allocation6 + $0x110] sm:$0xff] }
 0x270   :  { %v363_v31 = vsel %vm322_vm4, %v355_v28, 0.0  ;;  %782 = vmatpush2.msra.mxu1 %v654_v17  ;;  %710 = vmatprep.subr.mxu0 %v591_v23  ;;  %v571_v17 = vld [vmem:[#allocation6 + $0x108] sm:$0xff] }
 0x271   :  { %v359_v32 = vrot.slane %v358_v30, 2  ;;  %v364_v33 = vrot.slane %v363_v31, 4  ;;  %783 = vmatprep.subr.mxu1 %v653_v27 }
 0x273   :  { %v360_v35 = vadd.f32 %v359_v32, %v358_v30  ;;  %v365_v34 = vadd.f32 %v364_v33, %v363_v31  ;;  %v590_v30 = vld [vmem:[#allocation6 + $0x1a0] sm:$0xff]  ;;  %v652_v31 = vld [vmem:[#allocation6 + $0x390] sm:$0xff]  ;;  %v589_v32 = vld [vmem:[#allocation6 + $0x198] sm:$0xff] }
 0x274   :  { %711 = vmatpush2.msra.mxu0 %v590_v30  ;;  %784 = vmatpush2.msra.mxu1 %v652_v31  ;;  %v651_v33 = vld [vmem:[#allocation6 + $0x388] sm:$0xff] }
 0x275   :  { %v361_v36 = vrot.slane %v360_v35, 1  ;;  %v366_v37 = vrot.slane %v365_v34, 2  ;;  %712 = vmatprep.subr.mxu0 %v589_v32  ;;  %785 = vmatprep.subr.mxu1 %v651_v33 }
 0x277   :  { %v362_v39 = vadd.f32 %v361_v36, %v360_v35  ;;  %v367_v40 = vadd.f32 %v366_v37, %v365_v34  ;;  %v588_v35 = vld [vmem:[#allocation6 + $0x190] sm:$0xff]  ;;  %v650_v34 = vld [vmem:[#allocation6 + $0x380] sm:$0xff]  ;;  %v587_v37 = vld [vmem:[#allocation6 + $0x188] sm:$0xff] }
 0x278   :  { %713 = vmatpush2.msra.mxu0 %v588_v35  ;;  %786 = vmatpush2.msra.mxu1 %v650_v34 }
 0x279   :  { %v377_v41 = vadd.f32 %v918_v38, %v362_v39  ;;  %v368_v42 = vrot.slane %v367_v40, 1  ;;  %714 = vmatprep.subr.mxu0 %v587_v37 }
 0x27b   :  { %v919_v43 = vmul.f32 -1.442695, %v377_v41  ;;  %v369_v44 = vadd.f32 %v368_v42, %v367_v40  ;;  %v586_v40 = vld [vmem:[#allocation6 + $0x180] sm:$0xff]  ;;  %v648_v41 = vld [vmem:[#allocation6 + $0x370] sm:$0xff]  ;;  %v585_v42 = vld [vmem:[#allocation6 + $0x178] sm:$0xff] }
 0x27c   :  { %715 = vmatpush2.msra.mxu0 %v586_v40 }
 0x27d   :  { %932 = vpow2.f32 %v919_v43  ;;  %v378_v45 = vadd.f32 %v918_v38, %v369_v44  ;;  %v649_v38 = vld [vmem:[#allocation6 + $0x378] sm:$0xff]  ;;  %v647_v43 = vld [vmem:[#allocation6 + $0x368] sm:$0xff]  ;;  %v584_v44 = vld [vmem:[#allocation6 + $0x170] sm:$0xff]  ;;  %716 = vmatprep.subr.mxu0 %v585_v42 }
 0x27e   :  { %787 = vmatprep.subr.mxu1 %v649_v38  ;;  %717 = vmatpush2.msra.mxu0 %v584_v44 }
 0x27f   :  { %v920_v46 = vmul.f32 -1.442695, %v378_v45  ;;  %v646_v45 = vld [vmem:[#allocation6 + $0x360] sm:$0xff]  ;;  %788 = vmatpush2.msra.mxu1 %v648_v41 }
 0x280   :  { %789 = vmatprep.subr.mxu1 %v647_v43 }
 0x281   :  { %934 = vpow2.f32 %v920_v46  ;;  %v583_v46 = vld [vmem:[#allocation6 + $0x168] sm:$0xff]  ;;  %790 = vmatpush2.msra.mxu1 %v646_v45 }
 0x282   :  { %718 = vmatprep.subr.mxu0 %v583_v46 }
 0x28a   :  { %v933_v47 = vpop.eup %932 }
 0x28b   :  { %v385_v48 = vadd.f32 1.0, %v933_v47  ;;  %v645_v47 = vld [vmem:[#allocation6 + $0x358] sm:$0xff] }
 0x28c   :  { %791 = vmatprep.subr.mxu1 %v645_v47 }
 0x28d   :  { %936 = vrcp.f32 %v385_v48  ;;  %v582_v48 = vld [vmem:[#allocation6 + $0x160] sm:$0xff] }
 0x28e   :  { %v935_v24 = vpop.eup %934  ;;  %719 = vmatpush2.msra.mxu0 %v582_v48 }
 0x28f   :  { %v386_v49 = vadd.f32 1.0, %v935_v24  ;;  %v644_v24 = vld [vmem:[#allocation6 + $0x350] sm:$0xff] }
 0x290   :  { %792 = vmatpush2.msra.mxu1 %v644_v24 }
 0x291   :  { %938 = vrcp.f32 %v386_v49  ;;  %v581_v49 = vld [vmem:[#allocation6 + $0x158] sm:$0xff]  ;;  %793 = vmatprep.subr.mxu1 %v643_v50 }
 0x292   :  { %720 = vmatprep.subr.mxu0 %v581_v49  ;;  %794 = vmatpush2.msra.mxu1 %v642_v52 }
 0x293   :  { %721 = vmatpush2.msra.mxu0 %v580_v51  ;;  %795 = vmatprep.subr.mxu1 %v641_v54 }
 0x294   :  { %722 = vmatprep.subr.mxu0 %v579_v53  ;;  %796 = vmatpush2.msra.mxu1 %v640_v56 }
 0x295   :  { %723 = vmatpush2.msra.mxu0 %v578_v55  ;;  %797 = vmatprep.subr.mxu1 %v639_v58 }
 0x296   :  { %724 = vmatprep.subr.mxu0 %v577_v57  ;;  %798 = vmatpush2.msra.mxu1 %v638_v60 }
 0x297   :  { %725 = vmatpush2.msra.mxu0 %v576_v59  ;;  %799 = vmatprep.subr.mxu1 %v637_v62 }
 0x298   :  { %726 = vmatprep.subr.mxu0 %v575_v61  ;;  %800 = vmatpush2.msra.mxu1 %v636_v3 }
 0x299   :  { %727 = vmatpush2.msra.mxu0 %v574_v63  ;;  %801 = vmatprep.subr.mxu1 %v635_v10 }
 0x29a   :  { %v937_v22 = vpop.eup %936  ;;  %728 = vmatprep.subr.mxu0 %v573_v7  ;;  %802 = vmatpush2.msra.mxu1 %v634_v16 }
 0x29b   :  { %v394_v28 = vrot.slane %v937_v22, %v1125_v26  ;;  %v570_v22 = vld [vmem:[#allocation6 + $0x100] sm:$0xff]  ;;  %729 = vmatpush2.msra.mxu0 %v572_v11 }
 0x29c   :  { %730 = vmatprep.subr.mxu0 %v571_v17 }
 0x29d   :  { %400 = vbcast.lane.b32.xlu1 %v394_v28, 264  ;;  %396 = vbcast.lane.b32.xlu0 %v394_v28, 256 }
 0x29e   :  { %v939_v36 = vpop.eup %938  ;;  %731 = vmatpush2.msra.mxu0 %v570_v22 }
 0x29f   :  { %v413_v39 = vrot.slane %v939_v36, %v1125_v26 }
 0x2a1   :  { %419 = vbcast.lane.b32.xlu1 %v413_v39, 264  ;;  %415 = vbcast.lane.b32.xlu0 %v413_v39, 256 }
 0x2a5   :  { %423 = vbcast.lane.b32.xlu1 %v413_v39, 272  ;;  %404 = vbcast.lane.b32.xlu0 %v394_v28, 272 }
 0x2a9   :  { %427 = vbcast.lane.b32.xlu1 %v413_v39, 280  ;;  %408 = vbcast.lane.b32.xlu0 %v394_v28, 280 }
 0x30f   :  { %v397_v23 = vpop.permute.xlu0 %396  ;;  %v401_v27 = vpop.permute.xlu1 %400 }
 0x310   :  { %v1170_v31 = vmul.f32 %v397_v23, %v1077_v2  ;;  %v1173_v32 = vmul.f32 %v397_v23, %v1081_v4  ;;  %v1176_v33 = vmul.f32 %v401_v27, %v1089_v8  ;;  %v1179_v35 = vmul.f32 %v401_v27, %v1091_v9 }
 0x312   :  { %v445_v8 = vadd.f32 %v1176_v33, %v1170_v31  ;;  %v454_v9 = vadd.f32 %v1179_v35, %v1173_v32 }
 0x313   :  { %v416_v28 = vpop.permute.xlu0 %415  ;;  %v420_v30 = vpop.permute.xlu1 %419 }
 0x314   :  { %v1182_v34 = vmul.f32 %v416_v28, %v1073_v0  ;;  %v1185_v36 = vmul.f32 %v416_v28, %v1075_v1  ;;  %v1188_v37 = vmul.f32 %v420_v30, %v1083_v5  ;;  %v1191_v2 = vmul.f32 %v420_v30, %v1085_v6 }
 0x315   :  { %v486_v5 = vmax.f32 %v1170_v31, %v1176_v33  ;;  %v495_v6 = vmax.f32 %v1173_v32, %v1179_v35 }
 0x316   :  { %v463_v41 = vadd.f32 %v1188_v37, %v1182_v34  ;;  %v513_v42 = vmax.f32 %v1185_v36, %v1191_v2 }
 0x317   :  { %v405_v4 = vpop.permute.xlu0 %404  ;;  %v424_v38 = vpop.permute.xlu1 %423 }
 0x318   :  { %v1198_v0 = vmul.f32 %v405_v4, %v1101_v14  ;;  %v1201_v1 = vmul.f32 %v405_v4, %v1103_v15  ;;  %v1208_v39 = vmul.f32 %v424_v38, %v1097_v12  ;;  %v1211_v40 = vmul.f32 %v424_v38, %v1099_v13 }
 0x319   :  { %v472_v14 = vadd.f32 %v1191_v2, %v1185_v36  ;;  %v504_v15 = vmax.f32 %v1182_v34, %v1188_v37 }
 0x31a   :  { %v446_v43 = vadd.f32 %v445_v8, %v1198_v0  ;;  %v455_v12 = vadd.f32 %v454_v9, %v1201_v1  ;;  %v487_v44 = vmax.f32 %v486_v5, %v1198_v0  ;;  %v496_v13 = vmax.f32 %v495_v6, %v1201_v1 }
 0x31b   :  { %v409_v45 = vpop.permute.xlu0 %408  ;;  %v428_v46 = vpop.permute.xlu1 %427  ;;  %v464_v50 = vadd.f32 %v463_v41, %v1208_v39  ;;  %v473_v51 = vadd.f32 %v472_v14, %v1211_v40  ;;  %v505_v52 = vmax.f32 %v504_v15, %v1208_v39  ;;  %v514_v53 = vmax.f32 %v513_v42, %v1211_v40 }
 0x31c   :  { %v1226_v47 = vmul.f32 %v409_v45, %v1113_v20  ;;  %v1229_v48 = vmul.f32 %v409_v45, %v1115_v21  ;;  %v1232_v24 = vmul.f32 %v428_v46, %v1109_v18  ;;  %v1235_v49 = vmul.f32 %v428_v46, %v1111_v19 }
 0x31e   :  { %v447_v20 = vadd.f32 %v446_v43, %v1226_v47  ;;  %v456_v54 = vadd.f32 %v455_v12, %v1229_v48  ;;  %v488_v21 = vmax.f32 %v487_v44, %v1226_v47  ;;  %v497_v18 = vmax.f32 %v496_v13, %v1229_v48 }
 0x31f   :  { %v465_v55 = vadd.f32 %v464_v50, %v1232_v24  ;;  %v474_v19 = vadd.f32 %v473_v51, %v1235_v49  ;;  %v506_v56 = vmax.f32 %v505_v52, %v1232_v24  ;;  %v515_v57 = vmax.f32 %v514_v53, %v1235_v49 }
 0x320   :  { %v448_v58 = vrot.slane %v447_v20, 4  ;;  %v457_v59 = vrot.slane %v456_v54, 4  ;;  %v489_v60 = vrot.slane %v488_v21, 4  ;;  %v498_v61 = vrot.slane %v497_v18, 4 }
 0x321   :  { %v466_v62 = vrot.slane %v465_v55, 4  ;;  %v475_v63 = vrot.slane %v474_v19, 4  ;;  %v507_v3 = vrot.slane %v506_v56, 4  ;;  %v516_v7 = vrot.slane %v515_v57, 4 }
 0x322   :  { %v449_v10 = vadd.f32 %v448_v58, %v447_v20  ;;  %v458_v11 = vadd.f32 %v457_v59, %v456_v54  ;;  %v490_v16 = vmax.f32 %v488_v21, %v489_v60  ;;  %v499_v17 = vmax.f32 %v497_v18, %v498_v61 }
 0x323   :  { %v467_v22 = vadd.f32 %v466_v62, %v465_v55  ;;  %v476_v23 = vadd.f32 %v475_v63, %v474_v19  ;;  %v508_v27 = vmax.f32 %v506_v56, %v507_v3  ;;  %v517_v28 = vmax.f32 %v515_v57, %v516_v7 }
 0x324   :  { %v450_v30 = vrot.slane %v449_v10, 2  ;;  %v491_v4 = vrot.slane %v490_v16, 2  ;;  %v500_v38 = vrot.slane %v499_v17, 2  ;;  %v459_v8 = vrot.slane %v458_v11, 2 }
 0x325   :  { %v468_v9 = vrot.slane %v467_v22, 2  ;;  %v509_v5 = vrot.slane %v508_v27, 2  ;;  %v518_v6 = vrot.slane %v517_v28, 2  ;;  %v477_v41 = vrot.slane %v476_v23, 2 }
 0x326   :  { %v501_v14 = vmax.f32 %v499_v17, %v500_v38  ;;  %v492_v15 = vmax.f32 %v490_v16, %v491_v4  ;;  %v460_v42 = vadd.f32 %v459_v8, %v458_v11  ;;  %v451_v43 = vadd.f32 %v450_v30, %v449_v10 }
 0x327   :  { %v519_v12 = vmax.f32 %v517_v28, %v518_v6  ;;  %v510_v44 = vmax.f32 %v508_v27, %v509_v5  ;;  %v478_v13 = vadd.f32 %v477_v41, %v476_v23  ;;  %v469_v45 = vadd.f32 %v468_v9, %v467_v22 }
 0x328   :  { %v502_v46 = vrot.slane %v501_v14, 1  ;;  %v493_v50 = vrot.slane %v492_v15, 1  ;;  %v461_v51 = vrot.slane %v460_v42, 1  ;;  %v452_v52 = vrot.slane %v451_v43, 1 }
 0x329   :  { %v520_v53 = vrot.slane %v519_v12, 1  ;;  %v511_v20 = vrot.slane %v510_v44, 1  ;;  %v479_v54 = vrot.slane %v478_v13, 1  ;;  %v470_v21 = vrot.slane %v469_v45, 1 }
 0x32a   :  { %v503_v18 = vmax.f32 %v501_v14, %v502_v46  ;;  %v494_v55 = vmax.f32 %v492_v15, %v493_v50  ;;  %v462_v19 = vadd.f32 %v461_v51, %v460_v42  ;;  %v453_v56 = vadd.f32 %v452_v52, %v451_v43 }
 0x32b   :  { %v521_v57 = vmax.f32 %v519_v12, %v520_v53  ;;  %v512_v58 = vmax.f32 %v510_v44, %v511_v20  ;;  %v480_v59 = vadd.f32 %v479_v54, %v478_v13  ;;  %v471_v60 = vadd.f32 %v470_v21, %v469_v45 }
 0x32c   :  { %v483_v61 = vmul.f32 0.03125, %v462_v19  ;;  %v482_v62 = vmul.f32 0.03125, %v453_v56  ;;  %v667_v17 = vstv %s1289_s6  ;;  %v1019_v42 = vmov 1966171168   ;;  %s1020_s6 = smov [#allocation8]  }
 0x32d   :  { %v535_v63 = vsel %vm317_vm3, %v521_v57, %v503_v18  ;;  %v534_v3 = vsel %vm317_vm3, %v512_v58, %v494_v55  ;;  %v485_v7 = vmul.f32 0.03125, %v480_v59  ;;  %v484_v10 = vmul.f32 0.03125, %v471_v60  ;;  %s904_s17 = sshll.u32 %s1020_s6, 4  ;;  %s905_s17 = int_to_ptr.vmem [resolvable:$true] %s904_s17 }
 0x32e   :  { %803 = vmatprep.mubr.f32.mxu1 %v535_v63  ;;  %v826_v43 = vunpack.c.l.s4 %v1019_v42  ;;  %s988_s18 = scalar_lea.vmem %s905_s17, 2048  ;;  %p993_p11 = scmp.lt.s32.totalorder %s905_s17, %s905_s17 }
 0x32f   :  { %804 = vmatmul.mubr.f32.vlgmr.msra.gmra.mxu1 %v534_v3  ;;  %v527_v11 = vsel %vm317_vm3, %v485_v7, %v483_v61  ;;  %v526_v16 = vsel %vm317_vm3, %v484_v10, %v482_v62  ;;  %p989_p10 = scmp.ne.s32.totalorder %s905_s17, %s988_s18  ;;  %p994_p12 = scmp.lt.s32.totalorder %s988_s18, %s988_s18 }
 0x330   :  { %732 = vmatprep.mubr.f32.mxu0 %v527_v11  ;;  %v827_v12 = vunpack.c.0.s8 %v826_v43 }
 0x331   :  { %733 = vmatmul.mubr.f32.vlgmr.msra.gmra.mxu0 %v526_v16  ;;  %p995_p13 = por %p994_p12, %p993_p11 }
 0x332   :  { %v830_v13 = vsub.s32 %v827_v12, %v1122_v25 }
 0x333   :  { %p996_p0 = pnand %p995_p13, %p989_p10 }
 0x3ef   :  { %v805_v22 = vpop.f32.mrf.mxu1 }
 0x3f1   :  { %v734_v23 = vpop.f32.mrf.mxu0  ;;  %v807_v38 = vpop.f32.mrf.mxu1 }
 0x3f2   :  { %v735_v27 = vadd.f32 %v734_v23, %v667_v17 }
 0x3f3   :  { %v736_v28 = vpop.f32.mrf.mxu0 }
 0x3f4   :  { %v806_v30 = vadd.f32 %v805_v22, %v735_v27  ;;  %v737_v4 = vadd.f32 %v736_v28, %v667_v17 }
 0x3f6   :  { %v921_v8 = vmul.f32 -1.442695, %v806_v30  ;;  %v808_v9 = vadd.f32 %v807_v38, %v737_v4 }
 0x3f8   :  { %940 = vpow2.f32 %v921_v8  ;;  %v922_v5 = vmul.f32 -1.442695, %v808_v9 }
 0x3fa   :  { %942 = vpow2.f32 %v922_v5 }
 0x405   :  { %v941_v6 = vpop.eup %940 }
 0x406   :  { %v816_v41 = vadd.f32 1.0, %v941_v6 }
 0x407   :  { %v943_v14 = vpop.eup %942 }
 0x408   :  { %v817_v15 = vadd.f32 1.0, %v943_v14  ;;  %944 = vrcp.f32 %v816_v41 }
 0x40a   :  { %946 = vrcp.f32 %v817_v15 }
 0x415   :  { %v945_v44 = vpop.eup %944 }
 0x417   :  { %v947_v45 = vpop.eup %946 }
 0x418   :  { %v824_v46 = vcombine.low %v945_v44, %v947_v45 }
 0x41a   :  { %v831_v50 = vrot.slane %v824_v46, %v830_v13 }
 0x41c   :  { %v832_v51 = vcombine.high %v831_v50, %v831_v50  ;;  %v839_v52 = vrot.slane %v831_v50, %v830_v13 }
 0x41e   :  { %v846_v53 = vrot.slane %v832_v51, %v830_v13  ;;  %v850_v20 = vrot.slane %v839_v52, %v1125_v26  ;;  %v854_v54 = vrot.slane %v839_v52, %v1132_v29 }
 0x420   :  { %v858_v21 = vrot.slane %v846_v53, %v1125_v26  ;;  %v862_v18 = vrot.slane %v846_v53, %v1132_v29  ;;  %v867_v55 = vmul.f32 %v850_v20, %v1170_v31  ;;  %v868_v19 = vmul.f32 %v854_v54, %v1173_v32 }
 0x421   :  { %v869_v25 = vmul.f32 %v850_v20, %v1176_v33  ;;  %v870_v56 = vmul.f32 %v854_v54, %v1179_v35  ;;  %v871_v57 = vmul.f32 %v850_v20, %v1198_v0  ;;  %v872_v58 = vmul.f32 %v854_v54, %v1201_v1 }
 0x422   :  { %v873_v59 = vmul.f32 %v850_v20, %v1226_v47  ;;  %v874_v26 = vmul.f32 %v854_v54, %v1229_v48  ;;  %v875_v29 = vmul.f32 %v858_v21, %v1182_v34  ;;  %v876_v31 = vmul.f32 %v862_v18, %v1185_v36  ;;  %883 = vst [vmem:[#allocation8] sm:$0xff] %v867_v55 }
 0x423   :  { %884 = vst [vmem:[#allocation8 + $0x8] sm:$0xff] %v868_v19  ;;  %v877_v32 = vmul.f32 %v858_v21, %v1188_v37  ;;  %v878_v33 = vmul.f32 %v862_v18, %v1191_v2  ;;  %v879_v35 = vmul.f32 %v858_v21, %v1208_v39  ;;  %v880_v0 = vmul.f32 %v862_v18, %v1211_v40 }
 0x424   :  { %885 = vst [vmem:[#allocation8 + $0x10] sm:$0xff] %v869_v25  ;;  %886 = vst [vmem:[#allocation8 + $0x18] sm:$0xff] %v870_v56  ;;  %v881_v1 = vmul.f32 %v858_v21, %v1232_v24  ;;  %v882_v34 = vmul.f32 %v862_v18, %v1235_v49 }
 0x425   :  { %887 = vst [vmem:[#allocation8 + $0x20] sm:$0xff] %v871_v57  ;;  %888 = vst [vmem:[#allocation8 + $0x28] sm:$0xff] %v872_v58 }
 0x426   :  { %889 = vst [vmem:[#allocation8 + $0x30] sm:$0xff] %v873_v59  ;;  %890 = vst [vmem:[#allocation8 + $0x38] sm:$0xff] %v874_v26 }
 0x427   :  { %891 = vst [vmem:[#allocation8 + $0x40] sm:$0xff] %v875_v29  ;;  %892 = vst [vmem:[#allocation8 + $0x48] sm:$0xff] %v876_v31 }
 0x428   :  { %893 = vst [vmem:[#allocation8 + $0x50] sm:$0xff] %v877_v32  ;;  %894 = vst [vmem:[#allocation8 + $0x58] sm:$0xff] %v878_v33 }
 0x429   :  { %895 = vst [vmem:[#allocation8 + $0x60] sm:$0xff] %v879_v35  ;;  %896 = vst [vmem:[#allocation8 + $0x68] sm:$0xff] %v880_v0 }
 0x42a   :  { %897 = vst [vmem:[#allocation8 + $0x70] sm:$0xff] %v881_v1  ;;  %898 = vst [vmem:[#allocation8 + $0x78] sm:$0xff] %v882_v34 }
 0x42b   :  { %999 = shalt.err (!%p996_p0)
}
 0x42c   :  { %910 = dma.vmem_to_hbm [thread:$0]  %s905_s17, 2048, %s1290_s7, [#allocation5], %s1015_s27, %s1015_s27, %s1016_s28  }
 0x42d   :  { %1012 = dma.done.wait [#allocation5], 2048  }
 0x42e   :  { %1013 = vsyncadd [#allocation5], 4294965248 }
 0x42f   :  { %914 = vsyncpa [#allocation4], 1 }
 0x430   :  { %915 = vsyncpa [#allocation7], 1 }
 0x431   :  { %916 = vsyncpa [#allocation5], 1 }

// kernel: tpu_custom_call.1
= control target key start
LH: loop header
LB: loop body
LE: loop exit
PB: predicated region body
PF: predicated region fallthrough
CT: control target
= control target key end

     0   :  { %13 = vsyncpa [#allocation4], 0  ;;  %s1283_s0 = inlined_call_operand.hbm [shape: f32[2,32,256], index: 0, kind: input, shape index: {}]   ;;  %s1284_s1 = inlined_call_operand.vmem [shape: f32[2,32], index: 1, kind: input, shape index: {}]   ;;  %s1285_s2 = inlined_call_operand.vmem [shape: f32[1,2], index: 2, kind: input, shape index: {}]   ;;  %s1286_s3 = inlined_call_operand.vmem [shape: f32[2,32], index: 3, kind: input, shape index: {}]   ;;  %s1287_s4 = inlined_call_operand.vmem [shape: f32[1,32], index: 4, kind: input, shape index: {}]   ;;  %s1288_s5 = inlined_call_operand.hbm [shape: f32[512,256], index: 5, kind: input, shape index: {}]   ;;  %s1289_s6 = inlined_call_operand.<no memory space> [shape: f32[1], index: 6, kind: input, shape index: {}]   ;;  %s1290_s7 = inlined_call_operand.hbm [shape: f32[2,32,256], index: 7, kind: output, shape index: {}]  }
   0x1   :  { %14 = vsyncpa [#allocation7], 0 }
   0x2   :  { %15 = vsyncpa [#allocation5], 0  ;;  %s1014_s24 = smov [#allocation3]  }
   0x3   :  { %s21_s25 = sshll.u32 %s1014_s24, 4  ;;  %s22_s25 = int_to_ptr.vmem [resolvable:$true] %s21_s25 }
   0x4   :  { %s956_s26 = scalar_lea.vmem %s22_s25, 2048  ;;  %p961_p1 = scmp.lt.s32.totalorder %s22_s25, %s22_s25 }
   0x5   :  { %p957_p0 = scmp.ne.s32.totalorder %s22_s25, %s956_s26  ;;  %p962_p2 = scmp.lt.s32.totalorder %s956_s26, %s956_s26 }
   0x7   :  { %p963_p3 = por %p962_p2, %p961_p1 }
   0x9   :  { %p964_p4 = pnand %p963_p3, %p957_p0 }
   0xb   :  { %967 = shalt.err (!%p964_p4)
}
   0xc   :  { %s1015_s27 = smov 256   ;;  %s1016_s28 = smov 16  }
   0xd   :  { %27 = dma.hbm_to_vmem [thread:$0]  %s1283_s0, 2048, %s22_s25, [#allocation4], %s1015_s27, %s1015_s27, %s1016_s28  }
   0xe   :  { %s1017_s8 = smov [#allocation6]  }
   0xf   :  { %s41_s9 = sshll.u32 %s1017_s8, 4  ;;  %s42_s9 = int_to_ptr.vmem [resolvable:$true] %s41_s9 }
  0x10   :  { %s976_s10 = scalar_lea.vmem %s42_s9, 16384  ;;  %p981_p6 = scmp.lt.s32.totalorder %s42_s9, %s42_s9 }
  0x11   :  { %p977_p5 = scmp.ne.s32.totalorder %s42_s9, %s976_s10  ;;  %p982_p7 = scmp.lt.s32.totalorder %s976_s10, %s976_s10 }
  0x13   :  { %p983_p8 = por %p982_p7, %p981_p6 }
  0x15   :  { %p984_p9 = pnand %p983_p8, %p977_p5 }
  0x17   :  { %987 = shalt.err (!%p984_p9)
}
  0x18   :  { %47 = dma.hbm_to_vmem [thread:$0]  %s1288_s5, 16384, %s42_s9, [#allocation7], %s1015_s27, %s1015_s27, %s1016_s28  }
  0x19   :  { %1008 = dma.done.wait [#allocation4], 2048  }
  0x1a   :  { %1009 = vsyncadd [#allocation4], 4294965248 }
  0x1b   :  { %1010 = dma.done.wait [#allocation7], 16384  }
  0x1c   :  { %1011 = vsyncadd [#allocation7], 4294950912  ;;  %v1073_v0 = vld [vmem:[#allocation3 + $0x40] sm:$0xff]  ;;  %v1075_v1 = vld [vmem:[#allocation3 + $0x48] sm:$0xff]  ;;  %v107_v24 = vlaneseq  ;;  %v1018_v30 = vmov 0   ;;  %vm244_vm0 = vcmask 130112  }
  0x1d   :  { %v1077_v2 = vld [vmem:[#allocation3] sm:$0xff]  ;;  %v84_v3 = vadd.f32 %v1075_v1, %v1073_v0  ;;  %v1081_v4 = vld [vmem:[#allocation3 + $0x8] sm:$0xff]  ;;  %v1083_v5 = vld [vmem:[#allocation3 + $0x50] sm:$0xff]  ;;  %931 = vset.pattern.permute.xlu1 %v1018_v30  ;;  %930 = vset.pattern.permute.xlu0 %v1018_v30  ;;  %vm251_vm1 = vcmask 195712   ;;  %vm258_vm2 = vcmask 261312   ;;  %vm317_vm3 = vcmask 1041409  }
  0x1e   :  { %v1085_v6 = vld [vmem:[#allocation3 + $0x58] sm:$0xff]  ;;  %v72_v7 = vadd.f32 %v1081_v4, %v1077_v2  ;;  %v1089_v8 = vld [vmem:[#allocation3 + $0x10] sm:$0xff]  ;;  %v1097_v12 = vld [vmem:[#allocation3 + $0x60] sm:$0xff]  ;;  %v1122_v25 = vshrl.u32 %v107_v24, 7  ;;  %vm322_vm4 = vcmask 254976  }
  0x1f   :  { %v1091_v9 = vld [vmem:[#allocation3 + $0x18] sm:$0xff]  ;;  %85 = vadd.xlane.f32.xlu1 %v84_v3  ;;  %v87_v10 = vadd.f32 %v1085_v6, %v1083_v5  ;;  %v1099_v13 = vld [vmem:[#allocation3 + $0x68] sm:$0xff]  ;;  %v1101_v14 = vld [vmem:[#allocation3 + $0x20] sm:$0xff] }
  0x20   :  { %73 = vadd.xlane.f32.xlu0 %v72_v7  ;;  %v75_v11 = vadd.f32 %v1091_v9, %v1089_v8  ;;  %v1103_v15 = vld [vmem:[#allocation3 + $0x28] sm:$0xff]  ;;  %v90_v16 = vadd.f32 %v1099_v13, %v1097_v12  ;;  %v1109_v18 = vld [vmem:[#allocation3 + $0x70] sm:$0xff]  ;;  %v1111_v19 = vld [vmem:[#allocation3 + $0x78] sm:$0xff]  ;;  %v1125_v26 = vsub.s32 0, %v1122_v25  ;;  %v1132_v29 = vsub.s32 1, %v1122_v25 }
  0x21   :  { %v78_v17 = vadd.f32 %v1103_v15, %v1101_v14  ;;  %v1113_v20 = vld [vmem:[#allocation3 + $0x30] sm:$0xff]  ;;  %v1115_v21 = vld [vmem:[#allocation3 + $0x38] sm:$0xff]  ;;  %v93_v22 = vadd.f32 %v1111_v19, %v1109_v18  ;;  %v105_v27 = vld [vmem:[%s1284_s1] sm:$0x3] }
  0x22   :  { %v81_v23 = vadd.f32 %v1115_v21, %v1113_v20  ;;  %v110_v28 = vrot.slane %v105_v27, %v1125_v26  ;;  %v129_v31 = vrot.slane %v105_v27, %v1132_v29 }
  0x23   :  { %88 = vadd.xlane.f32.xlu1 %v87_v10 }
  0x24   :  { %76 = vadd.xlane.f32.xlu0 %v75_v11 }
  0x27   :  { %91 = vadd.xlane.f32.xlu1 %v90_v16 }
  0x28   :  { %79 = vadd.xlane.f32.xlu0 %v78_v17 }
  0x2b   :  { %94 = vadd.xlane.f32.xlu1 %v93_v22 }
  0x2c   :  { %82 = vadd.xlane.f32.xlu0 %v81_v23 }
  0x3c   :  { %116 = vbcast.lane.b32.xlu1 %v110_v28, 264 }
  0x40   :  { %131 = vbcast.lane.b32.xlu1 %v129_v31, 256 }
  0x42   :  { %112 = vbcast.lane.b32.xlu0 %v110_v28, 256 }
  0x44   :  { %135 = vbcast.lane.b32.xlu1 %v129_v31, 264 }
  0x46   :  { %120 = vbcast.lane.b32.xlu0 %v110_v28, 272 }
  0x48   :  { %139 = vbcast.lane.b32.xlu1 %v129_v31, 272 }
  0x4a   :  { %124 = vbcast.lane.b32.xlu0 %v110_v28, 280 }
  0x4c   :  { %143 = vbcast.lane.b32.xlu1 %v129_v31, 280 }
  0xa8   :  { %v86_v32 = vpop.xlane.xlu1 %85 }
  0xa9   :  { %v74_v33 = vpop.xlane.xlu0 %73  ;;  %v101_v48 = vmul.f32 0.00390625, %v86_v32 }
  0xaa   :  { %v97_v41 = vmul.f32 0.00390625, %v74_v33  ;;  %v234_v33 = vand.u32 127, %v107_v24 }
  0xac   :  { %v89_v34 = vpop.xlane.xlu1 %88 }
  0xad   :  { %v77_v35 = vpop.xlane.xlu0 %76  ;;  %v102_v52 = vmul.f32 0.00390625, %v89_v34 }
  0xae   :  { %v98_v40 = vmul.f32 0.00390625, %v77_v35 }
  0xb0   :  { %v92_v36 = vpop.xlane.xlu1 %91 }
  0xb1   :  { %v80_v37 = vpop.xlane.xlu0 %79  ;;  %v103_v60 = vmul.f32 0.00390625, %v92_v36  ;;  %v239_v36 = vadd.s32 4294967288, %v234_v33 }
  0xb2   :  { %v99_v56 = vmul.f32 0.00390625, %v80_v37 }
  0xb4   :  { %v95_v38 = vpop.xlane.xlu1 %94 }
  0xb5   :  { %v83_v39 = vpop.xlane.xlu0 %82  ;;  %v104_v16 = vmul.f32 0.00390625, %v95_v38 }
  0xb6   :  { %v100_v3 = vmul.f32 0.00390625, %v83_v39  ;;  %v246_v39 = vadd.s32 4294967280, %v234_v33 }
  0xb8   :  { %v117_v42 = vpop.permute.xlu1 %116 }
  0xb9   :  { %v154_v43 = vmul.f32 %v117_v42, %v98_v40  ;;  %v113_v44 = vpop.permute.xlu0 %112  ;;  %v162_v53 = vmul.f32 %v117_v42, %v102_v52  ;;  %v237_v42 = vsub.s32 %v234_v33, %v1122_v25 }
  0xba   :  { %v153_v45 = vmul.f32 %v113_v44, %v97_v41  ;;  %v161_v50 = vmul.f32 %v113_v44, %v101_v48 }
  0xbb   :  { %189 = vperm.xlu1 %931, %v154_v43  }
  0xbc   :  { %186 = vperm.xlu0 %930, %v153_v45   ;;  %v132_v46 = vpop.permute.xlu1 %131  ;;  %v249_v45 = vsub.s32 %v246_v39, %v1122_v25  ;;  %v917_v39 = vld [vmem:[%s1285_s2] ss:$0 sm:$0xff] }
  0xbd   :  { %v157_v47 = vmul.f32 %v132_v46, %v97_v41  ;;  %v165_v54 = vmul.f32 %v132_v46, %v101_v48  ;;  %v121_v55 = vpop.permute.xlu0 %120  ;;  %v242_v41 = vsub.s32 %v239_v36, %v1122_v25 }
  0xbe   :  { %v155_v57 = vmul.f32 %v121_v55, %v99_v56  ;;  %v163_v61 = vmul.f32 %v121_v55, %v103_v60 }
  0xbf   :  { %198 = vperm.xlu1 %931, %v157_v47  }
  0xc0   :  { %v136_v49 = vpop.permute.xlu1 %135 }
  0xc1   :  { %v158_v51 = vmul.f32 %v136_v49, %v98_v40  ;;  %v166_v58 = vmul.f32 %v136_v49, %v102_v52  ;;  %v125_v63 = vpop.permute.xlu0 %124  ;;  %v253_v40 = vadd.s32 4294967272, %v234_v33 }
  0xc2   :  { %v156_v7 = vmul.f32 %v125_v63, %v100_v3  ;;  %v164_v17 = vmul.f32 %v125_v63, %v104_v16 }
  0xc3   :  { %210 = vperm.xlu1 %931, %v161_v50   ;;  %201 = vperm.xlu0 %930, %v158_v51   ;;  %v256_v46 = vsub.s32 %v253_v40, %v1122_v25 }
  0xc4   :  { %v140_v59 = vpop.permute.xlu1 %139 }
  0xc5   :  { %v159_v62 = vmul.f32 %v140_v59, %v99_v56  ;;  %v167_v10 = vmul.f32 %v140_v59, %v103_v60 }
  0xc7   :  { %222 = vperm.xlu1 %931, %v165_v54   ;;  %213 = vperm.xlu0 %930, %v162_v53  }
  0xc8   :  { %v144_v11 = vpop.permute.xlu1 %143 }
  0xc9   :  { %v160_v22 = vmul.f32 %v144_v11, %v100_v3  ;;  %v168_v23 = vmul.f32 %v144_v11, %v104_v16 }
  0xcb   :  { %225 = vperm.xlu0 %930, %v166_v58   ;;  %192 = vperm.xlu1 %931, %v155_v57  }
  0xcf   :  { %204 = vperm.xlu0 %930, %v159_v62   ;;  %216 = vperm.xlu1 %931, %v163_v61  }
  0xd3   :  { %228 = vperm.xlu0 %930, %v167_v10   ;;  %195 = vperm.xlu1 %931, %v156_v7  }
  0xd7   :  { %207 = vperm.xlu0 %930, %v160_v22   ;;  %219 = vperm.xlu1 %931, %v164_v17  }
  0xdb   :  { %231 = vperm.xlu0 %930, %v168_v23  }
 0x136   :  { %v190_v27 = vpop.permute.xlu1 %189 }
 0x137   :  { %v187_v28 = vpop.permute.xlu0 %186  ;;  %v243_v47 = vrot.slane %v190_v27, %v242_v41 }
 0x138   :  { %v238_v48 = vrot.slane %v187_v28, %v237_v42 }
 0x13a   :  { %v199_v30 = vpop.permute.xlu1 %198  ;;  %v245_v55 = vsel %vm244_vm0, %v243_v47, %v238_v48  ;;  %v633_v47 = vld [vmem:[#allocation6 + $0x2f8] sm:$0xff]  ;;  %v632_v48 = vld [vmem:[#allocation6 + $0x2f0] sm:$0xff] }
 0x13b   :  { %v263_v53 = vrot.slane %v199_v30, %v237_v42  ;;  %739 = vmatprep.subr.mxu1 %v633_v47  ;;  %v547_v47 = vld [vmem:[#allocation6 + $0x48] sm:$0xff] }
 0x13c   :  { %740 = vmatpush1.msra.mxu1 %v632_v48  ;;  %v610_v48 = vld [vmem:[#allocation6 + $0x240] sm:$0xff] }
 0x13e   :  { %v211_v31 = vpop.permute.xlu1 %210  ;;  %v202_v32 = vpop.permute.xlu0 %201 }
 0x13f   :  { %v267_v50 = vrot.slane %v202_v32, %v242_v41  ;;  %v282_v56 = vrot.slane %v211_v31, %v237_v42 }
 0x141   :  { %v268_v59 = vsel %vm244_vm0, %v267_v50, %v263_v53  ;;  %v568_v50 = vld [vmem:[#allocation6 + $0xf0] sm:$0xff]  ;;  %v629_v53 = vld [vmem:[#allocation6 + $0x2d8] sm:$0xff] }
 0x142   :  { %v223_v34 = vpop.permute.xlu1 %222  ;;  %v214_v35 = vpop.permute.xlu0 %213 }
 0x143   :  { %v286_v60 = vrot.slane %v214_v35, %v242_v41  ;;  %v301_v11 = vrot.slane %v223_v34, %v237_v42 }
 0x145   :  { %v287_v28 = vsel %vm244_vm0, %v286_v60, %v282_v56  ;;  %v565_v56 = vld [vmem:[#allocation6 + $0xd8] sm:$0xff]  ;;  %v626_v60 = vld [vmem:[#allocation6 + $0x2c0] sm:$0xff] }
 0x146   :  { %v193_v37 = vpop.permute.xlu1 %192  ;;  %v226_v38 = vpop.permute.xlu0 %225 }
 0x147   :  { %v250_v51 = vrot.slane %v193_v37, %v249_v45  ;;  %v305_v61 = vrot.slane %v226_v38, %v242_v41 }
 0x149   :  { %v252_v63 = vsel %vm251_vm1, %v250_v51, %v245_v55  ;;  %v306_v30 = vsel %vm244_vm0, %v305_v61, %v301_v11  ;;  %v630_v51 = vld [vmem:[#allocation6 + $0x2e0] sm:$0xff]  ;;  %v628_v55 = vld [vmem:[#allocation6 + $0x2d0] sm:$0xff]  ;;  %v559_v11 = vld [vmem:[#allocation6 + $0xa8] sm:$0xff] }
 0x14a   :  { %v217_v43 = vpop.permute.xlu1 %216  ;;  %v205_v44 = vpop.permute.xlu0 %204  ;;  %v562_v61 = vld [vmem:[#allocation6 + $0xc0] sm:$0xff] }
 0x14b   :  { %v272_v52 = vrot.slane %v205_v44, %v249_v45  ;;  %v291_v3 = vrot.slane %v217_v43, %v249_v45 }
 0x14d   :  { %v273_v7 = vsel %vm251_vm1, %v272_v52, %v268_v59  ;;  %v292_v33 = vsel %vm251_vm1, %v291_v3, %v287_v28  ;;  %v567_v52 = vld [vmem:[#allocation6 + $0xe8] sm:$0xff]  ;;  %v624_v3 = vld [vmem:[#allocation6 + $0x2b0] sm:$0xff] }
 0x14e   :  { %v196_v24 = vpop.permute.xlu1 %195  ;;  %v229_v49 = vpop.permute.xlu0 %228  ;;  %v563_v59 = vld [vmem:[#allocation6 + $0xc8] sm:$0xff]  ;;  %v556_v28 = vld [vmem:[#allocation6 + $0x90] sm:$0xff] }
 0x14f   :  { %v257_v54 = vrot.slane %v196_v24, %v256_v46  ;;  %v310_v10 = vrot.slane %v229_v49, %v249_v45  ;;  %v569_v24 = vld [vmem:[#allocation6 + $0xf8] sm:$0xff]  ;;  %v631_v49 = vld [vmem:[#allocation6 + $0x2e8] sm:$0xff] }
 0x150   :  { %668 = vmatprep.subr.mxu0 %v569_v24  ;;  %741 = vmatprep.subr.mxu1 %v631_v49  ;;  %v546_v24 = vld [vmem:[#allocation6 + $0x40] sm:$0xff]  ;;  %v609_v49 = vld [vmem:[#allocation6 + $0x238] sm:$0xff] }
 0x151   :  { %v259_v17 = vsel %vm258_vm2, %v257_v54, %v252_v63  ;;  %v311_v35 = vsel %vm251_vm1, %v310_v10, %v306_v30  ;;  %669 = vmatpush1.msra.mxu0 %v568_v50  ;;  %v566_v54 = vld [vmem:[#allocation6 + $0xe0] sm:$0xff]  ;;  %742 = vmatpush1.msra.mxu1 %v630_v51  ;;  %v561_v63 = vld [vmem:[#allocation6 + $0xb8] sm:$0xff]  ;;  %v623_v10 = vld [vmem:[#allocation6 + $0x2a8] sm:$0xff] }
 0x152   :  { %v220_v57 = vpop.permute.xlu1 %219  ;;  %v208_v58 = vpop.permute.xlu0 %207  ;;  %670 = vmatprep.subr.mxu0 %v567_v52  ;;  %743 = vmatprep.subr.mxu1 %v629_v53  ;;  %v619_v30 = vld [vmem:[#allocation6 + $0x288] sm:$0xff]  ;;  %v545_v50 = vld [vmem:[#allocation6 + $0x38] sm:$0xff]  ;;  %v608_v51 = vld [vmem:[#allocation6 + $0x230] sm:$0xff] }
 0x153   :  { %v277_v62 = vrot.slane %v208_v58, %v256_v46  ;;  %v296_v16 = vrot.slane %v220_v57, %v256_v46  ;;  %671 = vmatpush1.msra.mxu0 %v566_v54  ;;  %v627_v57 = vld [vmem:[#allocation6 + $0x2c8] sm:$0xff]  ;;  %v564_v58 = vld [vmem:[#allocation6 + $0xd0] sm:$0xff]  ;;  %744 = vmatpush1.msra.mxu1 %v628_v55  ;;  %v606_v55 = vld [vmem:[#allocation6 + $0x220] sm:$0xff] }
 0x154   :  { %672 = vmatprep.subr.mxu0 %v565_v56  ;;  %745 = vmatprep.subr.mxu1 %v627_v57  ;;  %v544_v52 = vld [vmem:[#allocation6 + $0x30] sm:$0xff]  ;;  %v607_v53 = vld [vmem:[#allocation6 + $0x228] sm:$0xff]  ;;  %v542_v56 = vld [vmem:[#allocation6 + $0x20] sm:$0xff] }
 0x155   :  { %v278_v22 = vsel %vm258_vm2, %v277_v62, %v273_v7  ;;  %v297_v34 = vsel %vm258_vm2, %v296_v16, %v292_v33  ;;  %673 = vmatpush1.msra.mxu0 %v564_v58  ;;  %v625_v62 = vld [vmem:[#allocation6 + $0x2b8] sm:$0xff]  ;;  %v560_v7 = vld [vmem:[#allocation6 + $0xb0] sm:$0xff]  ;;  %746 = vmatpush1.msra.mxu1 %v626_v60  ;;  %v622_v16 = vld [vmem:[#allocation6 + $0x2a0] sm:$0xff] }
 0x156   :  { %v232_v23 = vpop.permute.xlu0 %231  ;;  %v318_v27 = vsel %vm317_vm3, %v278_v22, %v259_v17  ;;  %674 = vmatprep.subr.mxu0 %v563_v59  ;;  %747 = vmatprep.subr.mxu1 %v625_v62  ;;  %v558_v17 = vld [vmem:[#allocation6 + $0xa0] sm:$0xff]  ;;  %v621_v22 = vld [vmem:[#allocation6 + $0x298] sm:$0xff]  ;;  %v543_v54 = vld [vmem:[#allocation6 + $0x28] sm:$0xff] }
 0x157   :  { %v315_v31 = vrot.slane %v232_v23, %v256_v46  ;;  %v323_v32 = vsel %vm322_vm4, %v318_v27, 0.0  ;;  %675 = vmatpush1.msra.mxu0 %v562_v61  ;;  %748 = vmatpush1.msra.mxu1 %v624_v3  ;;  %v557_v23 = vld [vmem:[#allocation6 + $0x98] sm:$0xff]  ;;  %v620_v27 = vld [vmem:[#allocation6 + $0x290] sm:$0xff]  ;;  %v554_v33 = vld [vmem:[#allocation6 + $0x80] sm:$0xff] }
 0x158   :  { %324 = vadd.xlane.f32.xlu1 %v323_v32  ;;  %676 = vmatprep.subr.mxu0 %v561_v63  ;;  %v618_v32 = vld [vmem:[#allocation6 + $0x280] sm:$0xff]  ;;  %v605_v57 = vld [vmem:[#allocation6 + $0x218] sm:$0xff]  ;;  %v604_v59 = vld [vmem:[#allocation6 + $0x210] sm:$0xff] }
 0x159   :  { %v316_v36 = vsel %vm258_vm2, %v315_v31, %v311_v35  ;;  %677 = vmatpush1.msra.mxu0 %v560_v7  ;;  %749 = vmatprep.subr.mxu1 %v623_v10  ;;  %v555_v31 = vld [vmem:[#allocation6 + $0x88] sm:$0xff]  ;;  %v617_v35 = vld [vmem:[#allocation6 + $0x278] sm:$0xff]  ;;  %v540_v60 = vld [vmem:[#allocation6 + $0x10] sm:$0xff] }
 0x15a   :  { %v319_v37 = vsel %vm317_vm3, %v316_v36, %v297_v34  ;;  %678 = vmatprep.subr.mxu0 %v559_v11  ;;  %750 = vmatpush1.msra.mxu1 %v622_v16  ;;  %v553_v34 = vld [vmem:[#allocation6 + $0x78] sm:$0xff]  ;;  %v616_v36 = vld [vmem:[#allocation6 + $0x270] sm:$0xff]  ;;  %v603_v61 = vld [vmem:[#allocation6 + $0x208] sm:$0xff] }
 0x15b   :  { %v326_v38 = vsel %vm322_vm4, %v319_v37, 0.0  ;;  %679 = vmatpush1.msra.mxu0 %v558_v17  ;;  %751 = vmatprep.subr.mxu1 %v621_v22  ;;  %v552_v37 = vld [vmem:[#allocation6 + $0x70] sm:$0xff]  ;;  %v541_v58 = vld [vmem:[#allocation6 + $0x18] sm:$0xff]  ;;  %v539_v62 = vld [vmem:[#allocation6 + $0x8] sm:$0xff] }
 0x15c   :  { %327 = vadd.xlane.f32.xlu0 %v326_v38  ;;  %680 = vmatprep.subr.mxu0 %v557_v23  ;;  %v615_v38 = vld [vmem:[#allocation6 + $0x268] sm:$0xff]  ;;  %v602_v63 = vld [vmem:[#allocation6 + $0x200] sm:$0xff]  ;;  %v665_v7 = vld [vmem:[#allocation6 + $0x3f8] sm:$0xff] }
 0x15d   :  { %752 = vmatpush1.msra.mxu1 %v620_v27  ;;  %681 = vmatpush1.msra.mxu0 %v556_v28  ;;  %v538_v3 = vld [vmem:[#allocation6] sm:$0xff]  ;;  %v664_v10 = vld [vmem:[#allocation6 + $0x3f0] sm:$0xff] }
 0x15e   :  { %753 = vmatprep.subr.mxu1 %v619_v30  ;;  %682 = vmatprep.subr.mxu0 %v555_v31  ;;  %v343_v11 = vld [vmem:[%s1286_s3] sm:$0x3] }
 0x15f   :  { %754 = vmatpush1.msra.mxu1 %v618_v32  ;;  %683 = vmatpush1.msra.mxu0 %v554_v33 }
 0x160   :  { %755 = vmatprep.subr.mxu1 %v617_v35  ;;  %684 = vmatprep.subr.mxu0 %v553_v34 }
 0x161   :  { %756 = vmatpush1.msra.mxu1 %v616_v36  ;;  %685 = vmatpush1.msra.mxu0 %v552_v37 }
 0x162   :  { %757 = vmatprep.subr.mxu1 %v615_v38  ;;  %v918_v38 = vld [vmem:[%s1287_s4] ss:$0 sm:$0xff] }
 0x172   :  { %336 = vbcast.lane.b32.xlu0 %v917_v39, 256  ;;  %v551_v39 = vld [vmem:[#allocation6 + $0x68] sm:$0xff] }
 0x173   :  { %686 = vmatprep.subr.mxu0 %v551_v39 }
 0x1e1   :  { %v325_v41 = vpop.xlane.xlu1 %324 }
 0x1e5   :  { %v328_v40 = vpop.xlane.xlu0 %327 }
 0x1e9   :  { %v337_v42 = vpop.permute.xlu0 %336 }
 0x1ea   :  { %v339_v43 = vadd.f32 %v337_v42, %v325_v41  ;;  %v340_v44 = vadd.f32 %v337_v42, %v328_v40  ;;  %v614_v40 = vld [vmem:[#allocation6 + $0x260] sm:$0xff]  ;;  %v613_v42 = vld [vmem:[#allocation6 + $0x258] sm:$0xff] }
 0x1eb   :  { %v550_v41 = vld [vmem:[#allocation6 + $0x60] sm:$0xff]  ;;  %758 = vmatpush1.msra.mxu1 %v614_v40 }
 0x1ec   :  { %v341_v45 = vmax.f32 %v339_v43, 0.0  ;;  %v342_v46 = vmax.f32 %v340_v44, 0.0  ;;  %v549_v43 = vld [vmem:[#allocation6 + $0x58] sm:$0xff]  ;;  %v612_v44 = vld [vmem:[#allocation6 + $0x250] sm:$0xff]  ;;  %687 = vmatpush1.msra.mxu0 %v550_v41  ;;  %759 = vmatprep.subr.mxu1 %v613_v42 }
 0x1ed   :  { %688 = vmatprep.subr.mxu0 %v549_v43  ;;  %760 = vmatpush1.msra.mxu1 %v612_v44 }
 0x1ee   :  { %346 = vperm.xlu1 %931, %v341_v45   ;;  %v548_v45 = vld [vmem:[#allocation6 + $0x50] sm:$0xff] }
 0x1ef   :  { %689 = vmatpush1.msra.mxu0 %v548_v45 }
 0x1f0   :  { %690 = vmatprep.subr.mxu0 %v547_v47 }
 0x1f1   :  { %691 = vmatpush1.msra.mxu0 %v546_v24 }
 0x1f2   :  { %351 = vperm.xlu1 %931, %v342_v46   ;;  %v611_v46 = vld [vmem:[#allocation6 + $0x248] sm:$0xff]  ;;  %692 = vmatprep.subr.mxu0 %v545_v50  ;;  %v601_v50 = vld [vmem:[#allocation6 + $0x1f8] sm:$0xff] }
 0x1f3   :  { %761 = vmatprep.subr.mxu1 %v611_v46  ;;  %693 = vmatpush1.msra.mxu0 %v544_v52  ;;  %v600_v52 = vld [vmem:[#allocation6 + $0x1f0] sm:$0xff] }
 0x1f4   :  { %762 = vmatpush1.msra.mxu1 %v610_v48  ;;  %694 = vmatprep.subr.mxu0 %v543_v54  ;;  %v599_v54 = vld [vmem:[#allocation6 + $0x1e8] sm:$0xff] }
 0x1f5   :  { %763 = vmatprep.subr.mxu1 %v609_v49  ;;  %695 = vmatpush1.msra.mxu0 %v542_v56  ;;  %v598_v56 = vld [vmem:[#allocation6 + $0x1e0] sm:$0xff] }
 0x1f6   :  { %764 = vmatpush1.msra.mxu1 %v608_v51  ;;  %696 = vmatprep.subr.mxu0 %v541_v58  ;;  %v663_v51 = vld [vmem:[#allocation6 + $0x3e8] sm:$0xff]  ;;  %v597_v58 = vld [vmem:[#allocation6 + $0x1d8] sm:$0xff] }
 0x1f7   :  { %765 = vmatprep.subr.mxu1 %v607_v53  ;;  %697 = vmatpush1.msra.mxu0 %v540_v60  ;;  %v662_v53 = vld [vmem:[#allocation6 + $0x3e0] sm:$0xff]  ;;  %v596_v60 = vld [vmem:[#allocation6 + $0x1d0] sm:$0xff] }
 0x1f8   :  { %766 = vmatpush1.msra.mxu1 %v606_v55  ;;  %698 = vmatprep.subr.mxu0 %v539_v62  ;;  %v661_v55 = vld [vmem:[#allocation6 + $0x3d8] sm:$0xff]  ;;  %v595_v62 = vld [vmem:[#allocation6 + $0x1c8] sm:$0xff] }
 0x1f9   :  { %767 = vmatprep.subr.mxu1 %v605_v57  ;;  %699 = vmatpush1.msra.mxu0 %v538_v3  ;;  %v660_v57 = vld [vmem:[#allocation6 + $0x3d0] sm:$0xff]  ;;  %v594_v3 = vld [vmem:[#allocation6 + $0x1c0] sm:$0xff] }
 0x1fa   :  { %768 = vmatpush1.msra.mxu1 %v604_v59  ;;  %700 = vmatprep.subr.mxu0 %v601_v50  ;;  %v659_v59 = vld [vmem:[#allocation6 + $0x3c8] sm:$0xff] }
 0x1fb   :  { %769 = vmatprep.subr.mxu1 %v603_v61  ;;  %701 = vmatpush2.msra.mxu0 %v600_v52  ;;  %v658_v61 = vld [vmem:[#allocation6 + $0x3c0] sm:$0xff]  ;;  %v643_v50 = vld [vmem:[#allocation6 + $0x348] sm:$0xff] }
 0x1fc   :  { %770 = vmatpush1.msra.mxu1 %v602_v63  ;;  %702 = vmatprep.subr.mxu0 %v599_v54  ;;  %v657_v63 = vld [vmem:[#allocation6 + $0x3b8] sm:$0xff]  ;;  %v642_v52 = vld [vmem:[#allocation6 + $0x340] sm:$0xff] }
 0x1fd   :  { %771 = vmatprep.subr.mxu1 %v665_v7  ;;  %703 = vmatpush2.msra.mxu0 %v598_v56  ;;  %v656_v7 = vld [vmem:[#allocation6 + $0x3b0] sm:$0xff]  ;;  %v641_v54 = vld [vmem:[#allocation6 + $0x338] sm:$0xff] }
 0x1fe   :  { %772 = vmatpush2.msra.mxu1 %v664_v10  ;;  %704 = vmatprep.subr.mxu0 %v597_v58  ;;  %v593_v10 = vld [vmem:[#allocation6 + $0x1b8] sm:$0xff]  ;;  %v640_v56 = vld [vmem:[#allocation6 + $0x330] sm:$0xff]  ;;  %v639_v58 = vld [vmem:[#allocation6 + $0x328] sm:$0xff] }
 0x1ff   :  { %773 = vmatprep.subr.mxu1 %v663_v51  ;;  %705 = vmatpush2.msra.mxu0 %v596_v60  ;;  %v580_v51 = vld [vmem:[#allocation6 + $0x150] sm:$0xff]  ;;  %v638_v60 = vld [vmem:[#allocation6 + $0x320] sm:$0xff] }
 0x200   :  { %774 = vmatpush2.msra.mxu1 %v662_v53  ;;  %706 = vmatprep.subr.mxu0 %v595_v62  ;;  %v579_v53 = vld [vmem:[#allocation6 + $0x148] sm:$0xff]  ;;  %v637_v62 = vld [vmem:[#allocation6 + $0x318] sm:$0xff] }
 0x201   :  { %775 = vmatprep.subr.mxu1 %v661_v55  ;;  %707 = vmatpush2.msra.mxu0 %v594_v3  ;;  %v578_v55 = vld [vmem:[#allocation6 + $0x140] sm:$0xff]  ;;  %v636_v3 = vld [vmem:[#allocation6 + $0x310] sm:$0xff] }
 0x202   :  { %776 = vmatpush2.msra.mxu1 %v660_v57  ;;  %708 = vmatprep.subr.mxu0 %v593_v10  ;;  %v577_v57 = vld [vmem:[#allocation6 + $0x138] sm:$0xff]  ;;  %v635_v10 = vld [vmem:[#allocation6 + $0x308] sm:$0xff] }
 0x203   :  { %777 = vmatprep.subr.mxu1 %v659_v59  ;;  %v576_v59 = vld [vmem:[#allocation6 + $0x130] sm:$0xff] }
 0x204   :  { %778 = vmatpush2.msra.mxu1 %v658_v61  ;;  %v575_v61 = vld [vmem:[#allocation6 + $0x128] sm:$0xff] }
 0x205   :  { %779 = vmatprep.subr.mxu1 %v657_v63  ;;  %v574_v63 = vld [vmem:[#allocation6 + $0x120] sm:$0xff] }
 0x206   :  { %780 = vmatpush2.msra.mxu1 %v656_v7  ;;  %v573_v7 = vld [vmem:[#allocation6 + $0x118] sm:$0xff] }
 0x269   :  { %v347_v16 = vpop.permute.xlu1 %346 }
 0x26a   :  { %v354_v17 = vmul.f32 %v347_v16, %v343_v11  ;;  %v592_v16 = vld [vmem:[#allocation6 + $0x1b0] sm:$0xff] }
 0x26b   :  { %709 = vmatpush2.msra.mxu0 %v592_v16  ;;  %v634_v16 = vld [vmem:[#allocation6 + $0x300] sm:$0xff] }
 0x26c   :  { %v356_v22 = vsel %vm322_vm4, %v354_v17, 0.0  ;;  %v654_v17 = vld [vmem:[#allocation6 + $0x3a0] sm:$0xff] }
 0x26d   :  { %v357_v23 = vrot.slane %v356_v22, 4  ;;  %v352_v27 = vpop.permute.xlu1 %351 }
 0x26e   :  { %v355_v28 = vmul.f32 %v352_v27, %v343_v11  ;;  %v655_v11 = vld [vmem:[#allocation6 + $0x3a8] sm:$0xff]  ;;  %v653_v27 = vld [vmem:[#allocation6 + $0x398] sm:$0xff] }
 0x26f   :  { %v358_v30 = vadd.f32 %v357_v23, %v356_v22  ;;  %781 = vmatprep.subr.mxu1 %v655_v11  ;;  %v591_v23 = vld [vmem:[#allocation6 + $0x1a8] sm:$0xff]  ;;  %v572_v11 = vld [vmem:[#allocation6 + $0x110] sm:$0xff] }
 0x270   :  { %v363_v31 = vsel %vm322_vm4, %v355_v28, 0.0  ;;  %782 = vmatpush2.msra.mxu1 %v654_v17  ;;  %710 = vmatprep.subr.mxu0 %v591_v23  ;;  %v571_v17 = vld [vmem:[#allocation6 + $0x108] sm:$0xff] }
 0x271   :  { %v359_v32 = vrot.slane %v358_v30, 2  ;;  %v364_v33 = vrot.slane %v363_v31, 4  ;;  %783 = vmatprep.subr.mxu1 %v653_v27 }
 0x273   :  { %v360_v35 = vadd.f32 %v359_v32, %v358_v30  ;;  %v365_v34 = vadd.f32 %v364_v33, %v363_v31  ;;  %v590_v30 = vld [vmem:[#allocation6 + $0x1a0] sm:$0xff]  ;;  %v652_v31 = vld [vmem:[#allocation6 + $0x390] sm:$0xff]  ;;  %v589_v32 = vld [vmem:[#allocation6 + $0x198] sm:$0xff] }
 0x274   :  { %711 = vmatpush2.msra.mxu0 %v590_v30  ;;  %784 = vmatpush2.msra.mxu1 %v652_v31  ;;  %v651_v33 = vld [vmem:[#allocation6 + $0x388] sm:$0xff] }
 0x275   :  { %v361_v36 = vrot.slane %v360_v35, 1  ;;  %v366_v37 = vrot.slane %v365_v34, 2  ;;  %712 = vmatprep.subr.mxu0 %v589_v32  ;;  %785 = vmatprep.subr.mxu1 %v651_v33 }
 0x277   :  { %v362_v39 = vadd.f32 %v361_v36, %v360_v35  ;;  %v367_v40 = vadd.f32 %v366_v37, %v365_v34  ;;  %v588_v35 = vld [vmem:[#allocation6 + $0x190] sm:$0xff]  ;;  %v650_v34 = vld [vmem:[#allocation6 + $0x380] sm:$0xff]  ;;  %v587_v37 = vld [vmem:[#allocation6 + $0x188] sm:$0xff] }
 0x278   :  { %713 = vmatpush2.msra.mxu0 %v588_v35  ;;  %786 = vmatpush2.msra.mxu1 %v650_v34 }
 0x279   :  { %v377_v41 = vadd.f32 %v918_v38, %v362_v39  ;;  %v368_v42 = vrot.slane %v367_v40, 1  ;;  %714 = vmatprep.subr.mxu0 %v587_v37 }
 0x27b   :  { %v919_v43 = vmul.f32 -1.442695, %v377_v41  ;;  %v369_v44 = vadd.f32 %v368_v42, %v367_v40  ;;  %v586_v40 = vld [vmem:[#allocation6 + $0x180] sm:$0xff]  ;;  %v648_v41 = vld [vmem:[#allocation6 + $0x370] sm:$0xff]  ;;  %v585_v42 = vld [vmem:[#allocation6 + $0x178] sm:$0xff] }
 0x27c   :  { %715 = vmatpush2.msra.mxu0 %v586_v40 }
 0x27d   :  { %932 = vpow2.f32 %v919_v43  ;;  %v378_v45 = vadd.f32 %v918_v38, %v369_v44  ;;  %v649_v38 = vld [vmem:[#allocation6 + $0x378] sm:$0xff]  ;;  %v647_v43 = vld [vmem:[#allocation6 + $0x368] sm:$0xff]  ;;  %v584_v44 = vld [vmem:[#allocation6 + $0x170] sm:$0xff]  ;;  %716 = vmatprep.subr.mxu0 %v585_v42 }
 0x27e   :  { %787 = vmatprep.subr.mxu1 %v649_v38  ;;  %717 = vmatpush2.msra.mxu0 %v584_v44 }
 0x27f   :  { %v920_v46 = vmul.f32 -1.442695, %v378_v45  ;;  %v646_v45 = vld [vmem:[#allocation6 + $0x360] sm:$0xff]  ;;  %788 = vmatpush2.msra.mxu1 %v648_v41 }
 0x280   :  { %789 = vmatprep.subr.mxu1 %v647_v43 }
 0x281   :  { %934 = vpow2.f32 %v920_v46  ;;  %v583_v46 = vld [vmem:[#allocation6 + $0x168] sm:$0xff]  ;;  %790 = vmatpush2.msra.mxu1 %v646_v45 }
 0x282   :  { %718 = vmatprep.subr.mxu0 %v583_v46 }
 0x28a   :  { %v933_v47 = vpop.eup %932 }
 0x28b   :  { %v385_v48 = vadd.f32 1.0, %v933_v47  ;;  %v645_v47 = vld [vmem:[#allocation6 + $0x358] sm:$0xff] }
 0x28c   :  { %791 = vmatprep.subr.mxu1 %v645_v47 }
 0x28d   :  { %936 = vrcp.f32 %v385_v48  ;;  %v582_v48 = vld [vmem:[#allocation6 + $0x160] sm:$0xff] }
 0x28e   :  { %v935_v24 = vpop.eup %934  ;;  %719 = vmatpush2.msra.mxu0 %v582_v48 }
 0x28f   :  { %v386_v49 = vadd.f32 1.0, %v935_v24  ;;  %v644_v24 = vld [vmem:[#allocation6 + $0x350] sm:$0xff] }
 0x290   :  { %792 = vmatpush2.msra.mxu1 %v644_v24 }
 0x291   :  { %938 = vrcp.f32 %v386_v49  ;;  %v581_v49 = vld [vmem:[#allocation6 + $0x158] sm:$0xff]  ;;  %793 = vmatprep.subr.mxu1 %v643_v50 }
 0x292   :  { %720 = vmatprep.subr.mxu0 %v581_v49  ;;  %794 = vmatpush2.msra.mxu1 %v642_v52 }
 0x293   :  { %721 = vmatpush2.msra.mxu0 %v580_v51  ;;  %795 = vmatprep.subr.mxu1 %v641_v54 }
 0x294   :  { %722 = vmatprep.subr.mxu0 %v579_v53  ;;  %796 = vmatpush2.msra.mxu1 %v640_v56 }
 0x295   :  { %723 = vmatpush2.msra.mxu0 %v578_v55  ;;  %797 = vmatprep.subr.mxu1 %v639_v58 }
 0x296   :  { %724 = vmatprep.subr.mxu0 %v577_v57  ;;  %798 = vmatpush2.msra.mxu1 %v638_v60 }
 0x297   :  { %725 = vmatpush2.msra.mxu0 %v576_v59  ;;  %799 = vmatprep.subr.mxu1 %v637_v62 }
 0x298   :  { %726 = vmatprep.subr.mxu0 %v575_v61  ;;  %800 = vmatpush2.msra.mxu1 %v636_v3 }
 0x299   :  { %727 = vmatpush2.msra.mxu0 %v574_v63  ;;  %801 = vmatprep.subr.mxu1 %v635_v10 }
 0x29a   :  { %v937_v22 = vpop.eup %936  ;;  %728 = vmatprep.subr.mxu0 %v573_v7  ;;  %802 = vmatpush2.msra.mxu1 %v634_v16 }
 0x29b   :  { %v394_v28 = vrot.slane %v937_v22, %v1125_v26  ;;  %v570_v22 = vld [vmem:[#allocation6 + $0x100] sm:$0xff]  ;;  %729 = vmatpush2.msra.mxu0 %v572_v11 }
 0x29c   :  { %730 = vmatprep.subr.mxu0 %v571_v17 }
 0x29d   :  { %400 = vbcast.lane.b32.xlu1 %v394_v28, 264  ;;  %396 = vbcast.lane.b32.xlu0 %v394_v28, 256 }
 0x29e   :  { %v939_v36 = vpop.eup %938  ;;  %731 = vmatpush2.msra.mxu0 %v570_v22 }
 0x29f   :  { %v413_v39 = vrot.slane %v939_v36, %v1125_v26 }
 0x2a1   :  { %419 = vbcast.lane.b32.xlu1 %v413_v39, 264  ;;  %415 = vbcast.lane.b32.xlu0 %v413_v39, 256 }
 0x2a5   :  { %423 = vbcast.lane.b32.xlu1 %v413_v39, 272  ;;  %404 = vbcast.lane.b32.xlu0 %v394_v28, 272 }
 0x2a9   :  { %427 = vbcast.lane.b32.xlu1 %v413_v39, 280  ;;  %408 = vbcast.lane.b32.xlu0 %v394_v28, 280 }
 0x30f   :  { %v397_v23 = vpop.permute.xlu0 %396  ;;  %v401_v27 = vpop.permute.xlu1 %400 }
 0x310   :  { %v1170_v31 = vmul.f32 %v397_v23, %v1077_v2  ;;  %v1173_v32 = vmul.f32 %v397_v23, %v1081_v4  ;;  %v1176_v33 = vmul.f32 %v401_v27, %v1089_v8  ;;  %v1179_v35 = vmul.f32 %v401_v27, %v1091_v9 }
 0x312   :  { %v445_v8 = vadd.f32 %v1176_v33, %v1170_v31  ;;  %v454_v9 = vadd.f32 %v1179_v35, %v1173_v32 }
 0x313   :  { %v416_v28 = vpop.permute.xlu0 %415  ;;  %v420_v30 = vpop.permute.xlu1 %419 }
 0x314   :  { %v1182_v34 = vmul.f32 %v416_v28, %v1073_v0  ;;  %v1185_v36 = vmul.f32 %v416_v28, %v1075_v1  ;;  %v1188_v37 = vmul.f32 %v420_v30, %v1083_v5  ;;  %v1191_v2 = vmul.f32 %v420_v30, %v1085_v6 }
 0x315   :  { %v486_v5 = vmax.f32 %v1170_v31, %v1176_v33  ;;  %v495_v6 = vmax.f32 %v1173_v32, %v1179_v35 }
 0x316   :  { %v463_v41 = vadd.f32 %v1188_v37, %v1182_v34  ;;  %v513_v42 = vmax.f32 %v1185_v36, %v1191_v2 }
 0x317   :  { %v405_v4 = vpop.permute.xlu0 %404  ;;  %v424_v38 = vpop.permute.xlu1 %423 }
 0x318   :  { %v1198_v0 = vmul.f32 %v405_v4, %v1101_v14  ;;  %v1201_v1 = vmul.f32 %v405_v4, %v1103_v15  ;;  %v1208_v39 = vmul.f32 %v424_v38, %v1097_v12  ;;  %v1211_v40 = vmul.f32 %v424_v38, %v1099_v13 }
 0x319   :  { %v472_v14 = vadd.f32 %v1191_v2, %v1185_v36  ;;  %v504_v15 = vmax.f32 %v1182_v34, %v1188_v37 }
 0x31a   :  { %v446_v43 = vadd.f32 %v445_v8, %v1198_v0  ;;  %v455_v12 = vadd.f32 %v454_v9, %v1201_v1  ;;  %v487_v44 = vmax.f32 %v486_v5, %v1198_v0  ;;  %v496_v13 = vmax.f32 %v495_v6, %v1201_v1 }
 0x31b   :  { %v409_v45 = vpop.permute.xlu0 %408  ;;  %v428_v46 = vpop.permute.xlu1 %427  ;;  %v464_v50 = vadd.f32 %v463_v41, %v1208_v39  ;;  %v473_v51 = vadd.f32 %v472_v14, %v1211_v40  ;;  %v505_v52 = vmax.f32 %v504_v15, %v1208_v39  ;;  %v514_v53 = vmax.f32 %v513_v42, %v1211_v40 }
 0x31c   :  { %v1226_v47 = vmul.f32 %v409_v45, %v1113_v20  ;;  %v1229_v48 = vmul.f32 %v409_v45, %v1115_v21  ;;  %v1232_v24 = vmul.f32 %v428_v46, %v1109_v18  ;;  %v1235_v49 = vmul.f32 %v428_v46, %v1111_v19 }
 0x31e   :  { %v447_v20 = vadd.f32 %v446_v43, %v1226_v47  ;;  %v456_v54 = vadd.f32 %v455_v12, %v1229_v48  ;;  %v488_v21 = vmax.f32 %v487_v44, %v1226_v47  ;;  %v497_v18 = vmax.f32 %v496_v13, %v1229_v48 }
 0x31f   :  { %v465_v55 = vadd.f32 %v464_v50, %v1232_v24  ;;  %v474_v19 = vadd.f32 %v473_v51, %v1235_v49  ;;  %v506_v56 = vmax.f32 %v505_v52, %v1232_v24  ;;  %v515_v57 = vmax.f32 %v514_v53, %v1235_v49 }
 0x320   :  { %v448_v58 = vrot.slane %v447_v20, 4  ;;  %v457_v59 = vrot.slane %v456_v54, 4  ;;  %v489_v60 = vrot.slane %v488_v21, 4  ;;  %v498_v61 = vrot.slane %v497_v18, 4 }
 0x321   :  { %v466_v62 = vrot.slane %v465_v55, 4  ;;  %v475_v63 = vrot.slane %v474_v19, 4  ;;  %v507_v3 = vrot.slane %v506_v56, 4  ;;  %v516_v7 = vrot.slane %v515_v57, 4 }
 0x322   :  { %v449_v10 = vadd.f32 %v448_v58, %v447_v20  ;;  %v458_v11 = vadd.f32 %v457_v59, %v456_v54  ;;  %v490_v16 = vmax.f32 %v488_v21, %v489_v60  ;;  %v499_v17 = vmax.f32 %v497_v18, %v498_v61 }
 0x323   :  { %v467_v22 = vadd.f32 %v466_v62, %v465_v55  ;;  %v476_v23 = vadd.f32 %v475_v63, %v474_v19  ;;  %v508_v27 = vmax.f32 %v506_v56, %v507_v3  ;;  %v517_v28 = vmax.f32 %v515_v57, %v516_v7 }
 0x324   :  { %v450_v30 = vrot.slane %v449_v10, 2  ;;  %v491_v4 = vrot.slane %v490_v16, 2  ;;  %v500_v38 = vrot.slane %v499_v17, 2  ;;  %v459_v8 = vrot.slane %v458_v11, 2 }
 0x325   :  { %v468_v9 = vrot.slane %v467_v22, 2  ;;  %v509_v5 = vrot.slane %v508_v27, 2  ;;  %v518_v6 = vrot.slane %v517_v28, 2  ;;  %v477_v41 = vrot.slane %v476_v23, 2 }
 0x326   :  { %v501_v14 = vmax.f32 %v499_v17, %v500_v38  ;;  %v492_v15 = vmax.f32 %v490_v16, %v491_v4  ;;  %v460_v42 = vadd.f32 %v459_v8, %v458_v11  ;;  %v451_v43 = vadd.f32 %v450_v30, %v449_v10 }
 0x327   :  { %v519_v12 = vmax.f32 %v517_v28, %v518_v6  ;;  %v510_v44 = vmax.f32 %v508_v27, %v509_v5  ;;  %v478_v13 = vadd.f32 %v477_v41, %v476_v23  ;;  %v469_v45 = vadd.f32 %v468_v9, %v467_v22 }
 0x328   :  { %v502_v46 = vrot.slane %v501_v14, 1  ;;  %v493_v50 = vrot.slane %v492_v15, 1  ;;  %v461_v51 = vrot.slane %v460_v42, 1  ;;  %v452_v52 = vrot.slane %v451_v43, 1 }
 0x329   :  { %v520_v53 = vrot.slane %v519_v12, 1  ;;  %v511_v20 = vrot.slane %v510_v44, 1  ;;  %v479_v54 = vrot.slane %v478_v13, 1  ;;  %v470_v21 = vrot.slane %v469_v45, 1 }
 0x32a   :  { %v503_v18 = vmax.f32 %v501_v14, %v502_v46  ;;  %v494_v55 = vmax.f32 %v492_v15, %v493_v50  ;;  %v462_v19 = vadd.f32 %v461_v51, %v460_v42  ;;  %v453_v56 = vadd.f32 %v452_v52, %v451_v43 }
 0x32b   :  { %v521_v57 = vmax.f32 %v519_v12, %v520_v53  ;;  %v512_v58 = vmax.f32 %v510_v44, %v511_v20  ;;  %v480_v59 = vadd.f32 %v479_v54, %v478_v13  ;;  %v471_v60 = vadd.f32 %v470_v21, %v469_v45 }
 0x32c   :  { %v483_v61 = vmul.f32 0.03125, %v462_v19  ;;  %v482_v62 = vmul.f32 0.03125, %v453_v56  ;;  %v667_v17 = vstv %s1289_s6  ;;  %v1019_v42 = vmov 1966171168   ;;  %s1020_s6 = smov [#allocation8]  }
 0x32d   :  { %v535_v63 = vsel %vm317_vm3, %v521_v57, %v503_v18  ;;  %v534_v3 = vsel %vm317_vm3, %v512_v58, %v494_v55  ;;  %v485_v7 = vmul.f32 0.03125, %v480_v59  ;;  %v484_v10 = vmul.f32 0.03125, %v471_v60  ;;  %s904_s17 = sshll.u32 %s1020_s6, 4  ;;  %s905_s17 = int_to_ptr.vmem [resolvable:$true] %s904_s17 }
 0x32e   :  { %803 = vmatprep.mubr.f32.mxu1 %v535_v63  ;;  %v826_v43 = vunpack.c.l.s4 %v1019_v42  ;;  %s988_s18 = scalar_lea.vmem %s905_s17, 2048  ;;  %p993_p11 = scmp.lt.s32.totalorder %s905_s17, %s905_s17 }
 0x32f   :  { %804 = vmatmul.mubr.f32.vlgmr.msra.gmra.mxu1 %v534_v3  ;;  %v527_v11 = vsel %vm317_vm3, %v485_v7, %v483_v61  ;;  %v526_v16 = vsel %vm317_vm3, %v484_v10, %v482_v62  ;;  %p989_p10 = scmp.ne.s32.totalorder %s905_s17, %s988_s18  ;;  %p994_p12 = scmp.lt.s32.totalorder %s988_s18, %s988_s18 }
 0x330   :  { %732 = vmatprep.mubr.f32.mxu0 %v527_v11  ;;  %v827_v12 = vunpack.c.0.s8 %v826_v43 }
 0x331   :  { %733 = vmatmul.mubr.f32.vlgmr.msra.gmra.mxu0 %v526_v16  ;;  %p995_p13 = por %p994_p12, %p993_p11 }
 0x332   :  { %v830_v13 = vsub.s32 %v827_v12, %v1122_v25 }
 0x333   :  { %p996_p0 = pnand %p995_p13, %p989_p10 }
 0x3ef   :  { %v805_v22 = vpop.f32.mrf.mxu1 }
 0x3f1   :  { %v734_v23 = vpop.f32.mrf.mxu0  ;;  %v807_v38 = vpop.f32.mrf.mxu1 }
 0x3f2   :  { %v735_v27 = vadd.f32 %v734_v23, %v667_v17 }
 0x3f3   :  { %v736_v28 = vpop.f32.mrf.mxu0 }
 0x3f4   :  { %v806_v30 = vadd.f32 %v805_v22, %v735_v27  ;;  %v737_v4 = vadd.f32 %v736_v28, %v667_v17 }
 0x3f6   :  { %v921_v8 = vmul.f32 -1.442695, %v806_v30  ;;  %v808_v9 = vadd.f32 %v807_v38, %v737_v4 }
 0x3f8   :  { %940 = vpow2.f32 %v921_v8  ;;  %v922_v5 = vmul.f32 -1.442695, %v808_v9 }
 0x3fa   :  { %942 = vpow2.f32 %v922_v5 }
 0x405   :  { %v941_v6 = vpop.eup %940 }
 0x406   :  { %v816_v41 = vadd.f32 1.0, %v941_v6 }
 0x407   :  { %v943_v14 = vpop.eup %942 }
 0x408   :  { %v817_v15 = vadd.f32 1.0, %v943_v14  ;;  %944 = vrcp.f32 %v816_v41 }
 0x40a   :  { %946 = vrcp.f32 %v817_v15 }
 0x415   :  { %v945_v44 = vpop.eup %944 }
 0x417   :  { %v947_v45 = vpop.eup %946 }
 0x418   :  { %v824_v46 = vcombine.low %v945_v44, %v947_v45 }
 0x41a   :  { %v831_v50 = vrot.slane %v824_v46, %v830_v13 }
 0x41c   :  { %v832_v51 = vcombine.high %v831_v50, %v831_v50  ;;  %v839_v52 = vrot.slane %v831_v50, %v830_v13 }
 0x41e   :  { %v846_v53 = vrot.slane %v832_v51, %v830_v13  ;;  %v850_v20 = vrot.slane %v839_v52, %v1125_v26  ;;  %v854_v54 = vrot.slane %v839_v52, %v1132_v29 }
 0x420   :  { %v858_v21 = vrot.slane %v846_v53, %v1125_v26  ;;  %v862_v18 = vrot.slane %v846_v53, %v1132_v29  ;;  %v867_v55 = vmul.f32 %v850_v20, %v1170_v31  ;;  %v868_v19 = vmul.f32 %v854_v54, %v1173_v32 }
 0x421   :  { %v869_v25 = vmul.f32 %v850_v20, %v1176_v33  ;;  %v870_v56 = vmul.f32 %v854_v54, %v1179_v35  ;;  %v871_v57 = vmul.f32 %v850_v20, %v1198_v0  ;;  %v872_v58 = vmul.f32 %v854_v54, %v1201_v1 }
 0x422   :  { %v873_v59 = vmul.f32 %v850_v20, %v1226_v47  ;;  %v874_v26 = vmul.f32 %v854_v54, %v1229_v48  ;;  %v875_v29 = vmul.f32 %v858_v21, %v1182_v34  ;;  %v876_v31 = vmul.f32 %v862_v18, %v1185_v36  ;;  %883 = vst [vmem:[#allocation8] sm:$0xff] %v867_v55 }
 0x423   :  { %884 = vst [vmem:[#allocation8 + $0x8] sm:$0xff] %v868_v19  ;;  %v877_v32 = vmul.f32 %v858_v21, %v1188_v37  ;;  %v878_v33 = vmul.f32 %v862_v18, %v1191_v2  ;;  %v879_v35 = vmul.f32 %v858_v21, %v1208_v39  ;;  %v880_v0 = vmul.f32 %v862_v18, %v1211_v40 }
 0x424   :  { %885 = vst [vmem:[#allocation8 + $0x10] sm:$0xff] %v869_v25  ;;  %886 = vst [vmem:[#allocation8 + $0x18] sm:$0xff] %v870_v56  ;;  %v881_v1 = vmul.f32 %v858_v21, %v1232_v24  ;;  %v882_v34 = vmul.f32 %v862_v18, %v1235_v49 }
 0x425   :  { %887 = vst [vmem:[#allocation8 + $0x20] sm:$0xff] %v871_v57  ;;  %888 = vst [vmem:[#allocation8 + $0x28] sm:$0xff] %v872_v58 }
 0x426   :  { %889 = vst [vmem:[#allocation8 + $0x30] sm:$0xff] %v873_v59  ;;  %890 = vst [vmem:[#allocation8 + $0x38] sm:$0xff] %v874_v26 }
 0x427   :  { %891 = vst [vmem:[#allocation8 + $0x40] sm:$0xff] %v875_v29  ;;  %892 = vst [vmem:[#allocation8 + $0x48] sm:$0xff] %v876_v31 }
 0x428   :  { %893 = vst [vmem:[#allocation8 + $0x50] sm:$0xff] %v877_v32  ;;  %894 = vst [vmem:[#allocation8 + $0x58] sm:$0xff] %v878_v33 }
 0x429   :  { %895 = vst [vmem:[#allocation8 + $0x60] sm:$0xff] %v879_v35  ;;  %896 = vst [vmem:[#allocation8 + $0x68] sm:$0xff] %v880_v0 }
 0x42a   :  { %897 = vst [vmem:[#allocation8 + $0x70] sm:$0xff] %v881_v1  ;;  %898 = vst [vmem:[#allocation8 + $0x78] sm:$0xff] %v882_v34 }
 0x42b   :  { %999 = shalt.err (!%p996_p0)
}
 0x42c   :  { %910 = dma.vmem_to_hbm [thread:$0]  %s905_s17, 2048, %s1290_s7, [#allocation5], %s1015_s27, %s1015_s27, %s1016_s28  }
 0x42d   :  { %1012 = dma.done.wait [#allocation5], 2048  }
 0x42e   :  { %1013 = vsyncadd [#allocation5], 4294965248 }
 0x42f   :  { %914 = vsyncpa [#allocation4], 1 }
 0x430   :  { %915 = vsyncpa [#allocation7], 1 }
 0x431   :  { %916 = vsyncpa [#allocation5], 1 }

</bundles_post_ra>
